<compile_context>
chip_gen: v6e
topology: v6e:2x2x1
jax: 0.10.0
libtpu: 0.0.40
codegen_flags: <defaults>
</compile_context>

<pallas_src>
import functools

import jax
import jax.numpy as jnp
from jax import lax
from jax.experimental import pallas as pl
from jax.experimental.pallas import tpu as pltpu

LANE = 128

# Indices into the packed weight slab (each entry zero-padded to (128, 128)).
W1, W2, W3, WIH_E, WHH_E, WIH_D, WHH_D, W4, W5, W6 = range(10)
# Indices into the packed bias slab (each row zero-padded to 128 lanes).
B1, B2, B3, BE, BD, B4, B5, B6 = range(8)


# ---------------------------------------------------------------------------
# Pallas kernel: one invocation == the full forward pass over all time steps.
# ---------------------------------------------------------------------------
def rnn_ae_kernel(
    x_ref,            # (T*B, 128)       zero-padded input slab
    w_ref,            # (10, 128, 128)   packed, zero-padded weights (in, out)
    b_ref,            # (8, 128)         packed, zero-padded biases
    out_ref,          # (T*B, 128)       zero-padded output slab
    proj_ref,         # VMEM scratch: (T*B, 128)  encoder RNN input projections
    dec_ref,          # VMEM scratch: (T*B, 128)  decoder RNN hidden states
    *, seq_len, batch,
):
    f32 = jnp.float32

    def mm(a, b):
        return jnp.dot(a, b, preferred_element_type=f32)

    def bias(i):
        return b_ref[pl.ds(i, 1), :]                     # (1, 128)

    # ---- encoder MLP: Linear+ReLU x3, batched over all T*B rows ----
    h = jnp.maximum(mm(x_ref[...], w_ref[W1]) + bias(B1), 0.0)
    h = jnp.maximum(mm(h, w_ref[W2]) + bias(B2), 0.0)
    h = jnp.maximum(mm(h, w_ref[W3]) + bias(B3), 0.0)    # (T*B, 128)

    # ---- encoder RNN input projection (independent of h_{t-1}): batched ----
    proj_ref[...] = mm(h, w_ref[WIH_E]) + bias(BE)       # (T*B, 128)

    bd = bias(BD)

    def rows(t):
        return pl.ds(pl.multiple_of(t * batch, batch), batch)

    # ---- fused encoder/decoder recurrence; decoder lags encoder by 1 step ----
    # t = 0: encoder only (e_{-1} = 0).
    e0 = jnp.tanh(proj_ref[pl.ds(0, batch), :])
    d0 = jnp.zeros((batch, LANE), f32)

    def step(t, carry):
        e_prev, d_prev = carry                           # e_{t-1}, d_{t-2}
        # encoder step t: depends on e_{t-1}
        e_new = jnp.tanh(proj_ref[rows(t), :] + mm(e_prev, w_ref[WHH_E]))
        # decoder step t-1: depends on e_{t-1}, d_{t-2}; independent of e_new,
        # so the two matmul+tanh chains overlap within the iteration.
        d_new = jnp.tanh(mm(e_prev, w_ref[WIH_D]) + bd + mm(d_prev, w_ref[WHH_D]))
        dec_ref[rows(t - 1), :] = d_new
        return e_new, d_new

    unroll = True if seq_len <= 16 else 8                # cap unroll for long T
    e_last, d_prev = lax.fori_loop(1, seq_len, step, (e0, d0), unroll=unroll)

    # final decoder step: d_{T-1}
    d_last = jnp.tanh(mm(e_last, w_ref[WIH_D]) + bd + mm(d_prev, w_ref[WHH_D]))
    dec_ref[pl.ds((seq_len - 1) * batch, batch), :] = d_last

    # ---- decoder MLP: ReLU, Linear+ReLU x2, Linear, batched ----
    y = jnp.maximum(dec_ref[...], 0.0)
    y = jnp.maximum(mm(y, w_ref[W4]) + bias(B4), 0.0)
    y = jnp.maximum(mm(y, w_ref[W5]) + bias(B5), 0.0)
    y = mm(y, w_ref[W6]) + bias(B6)
    out_ref[...] = y                                      # lane-dense 128-wide store


# ---------------------------------------------------------------------------
# Wrapper: pads to 128 lanes, packs weights/biases into slabs, calls pallas_call.
# ---------------------------------------------------------------------------
def rnn_autoencoder_forward(x, params):
    T, B, D_in = x.shape
    H = params["whh_e"].shape[0]                 # logical inner_size
    assert D_in <= LANE and H <= LANE, "feature/hidden dims must fit in 128 lanes"

    Bp = -(-B // 8) * 8                          # sublane-align the batch (f32: 8)

    def pad2(a, rows, cols):
        out = jnp.zeros((rows, cols), jnp.float32)
        return out.at[: a.shape[0], : a.shape[1]].set(a.astype(jnp.float32))

    w_names = ["w1", "w2", "w3", "wih_e", "whh_e", "wih_d", "whh_d", "w4", "w5", "w6"]
    b_names = ["b1", "b2", "b3", "be", "bd", "b4", "b5", "b6"]
    w_slab = jnp.stack([pad2(params[n], LANE, LANE) for n in w_names])         # (10,128,128)
    b_slab = jnp.concatenate([pad2(params[n], 1, LANE) for n in b_names], 0)   # (8,128)

    # Zero-pad batch to a sublane multiple and features to the full lane width.
    # Padded lanes/rows stay exactly zero through the whole network.
    xp = jnp.zeros((T, Bp, LANE), jnp.float32).at[:, :B, :D_in].set(x)
    x2 = xp.reshape(T * Bp, LANE)

    kernel = functools.partial(rnn_ae_kernel, seq_len=T, batch=Bp)

    fn = pl.pallas_call(
        kernel,
        out_shape=jax.ShapeDtypeStruct((T * Bp, LANE), jnp.float32),
        in_specs=[pl.BlockSpec(memory_space=pltpu.MemorySpace.VMEM)] * 3,
        out_specs=pl.BlockSpec(memory_space=pltpu.MemorySpace.VMEM),
        scratch_shapes=[
            pltpu.VMEM((T * Bp, LANE), jnp.float32),   # encoder RNN input projections
            pltpu.VMEM((T * Bp, LANE), jnp.float32),   # decoder RNN hidden states
        ],
    )
    y = fn(x2, w_slab, b_slab)
    return y.reshape(T, Bp, LANE)[:, :B, :D_in]


# ---------------------------------------------------------------------------
# Pure-JAX reference (mirrors the PyTorch forward exactly) for validation.
# ---------------------------------------------------------------------------
def reference_forward(x, p):
    def lin(v, w, b):
        return v @ w + b

    h = jax.nn.relu(lin(x, p["w1"], p["b1"]))
    h = jax.nn.relu(lin(h, p["w2"], p["b2"]))
    h = jax.nn.relu(lin(h, p["w3"], p["b3"]))          # (T, B, 32)

    def rnn(inp, wih, whh, b, hidden):
        def step(hprev, xt):
            hnew = jnp.tanh(xt @ wih + hprev @ whh + b)
            return hnew, hnew
        h0 = jnp.zeros((inp.shape[1], hidden), jnp.float32)
        _, outs = jax.lax.scan(step, h0, inp)
        return outs

    enc = rnn(h, p["wih_e"], p["whh_e"], p["be"], p["whh_e"].shape[0])   # (T, B, H)
    dec = rnn(enc, p["wih_d"], p["whh_d"], p["bd"], 32)                  # (T, B, 32)

    y = jax.nn.relu(dec)
    y = jax.nn.relu(lin(y, p["w4"], p["b4"]))
    y = jax.nn.relu(lin(y, p["w5"], p["b5"]))
    y = lin(y, p["w6"], p["b6"])
    return y


# ---------------------------------------------------------------------------
# Deterministic parameter init (shapes follow the PyTorch module).
# ---------------------------------------------------------------------------
def init_params(key, input_size, inner_size):
    ks = jax.random.split(key, 16)
    s = 0.1

    def w(k, shape):
        return (s * jax.random.normal(k, shape)).astype(jnp.float32)

    return {
        # encoder MLP (stored transposed: (in, out))
        "w1": w(ks[0], (input_size, 128)), "b1": w(ks[1], (1, 128)),
        "w2": w(ks[2], (128, 64)),         "b2": w(ks[3], (1, 64)),
        "w3": w(ks[4], (64, 32)),          "b3": w(ks[5], (1, 32)),
        # encoder RNN (32 -> inner_size); bias = b_ih + b_hh folded together
        "wih_e": w(ks[6], (32, inner_size)),
        "whh_e": w(ks[7], (inner_size, inner_size)),
        "be":    w(ks[8], (1, inner_size)),
        # decoder RNN (inner_size -> 32)
        "wih_d": w(ks[9], (inner_size, 32)),
        "whh_d": w(ks[10], (32, 32)),
        "bd":    w(ks[11], (1, 32)),
        # decoder MLP
        "w4": w(ks[12], (32, 64)),          "b4": w(ks[13], (1, 64)),
        "w5": w(ks[14], (64, 128)),         "b5": w(ks[15], (1, 128)),
        "w6": w(jax.random.fold_in(key, 99), (128, input_size)),
        "b6": w(jax.random.fold_in(key, 100), (1, input_size)),
    }


if __name__ == "__main__":
    key = jax.random.PRNGKey(0)
    T, B, D_IN, INNER = 8, 8, 16, 20          # seq=8, batch=8, input_size=16

    pkey, xkey = jax.random.split(key)
    params = init_params(pkey, D_IN, INNER)
    x = jax.random.normal(xkey, (T, B, D_IN), dtype=jnp.float32)

    out = rnn_autoencoder_forward(x, params)
    out = jax.block_until_ready(out)

    ref = reference_forward(x, params)
    assert out.shape == (T, B, D_IN)
    assert jnp.allclose(out, ref, atol=1e-4, rtol=1e-4), (
        f"max abs err = {jnp.max(jnp.abs(out - ref))}")

    print("KERNEL_OK")
</pallas_src>

<mosaic_0001>
module attributes {stable_mosaic.version = 11 : i64} {
  func.func @rnn_ae_kernel(%arg0: memref<64x128xf32, #tpu.memory_space<vmem>>, %arg1: memref<10x128x128xf32, #tpu.memory_space<vmem>>, %arg2: memref<8x128xf32, #tpu.memory_space<vmem>>, %arg3: memref<64x128xf32, #tpu.memory_space<vmem>>, %arg4: memref<64x128xf32, #tpu.memory_space<vmem>>, %arg5: memref<64x128xf32, #tpu.memory_space<vmem>>) attributes {dimension_semantics = [], scalar_prefetch = 0 : i64, scratch_operands = 2 : i64, tpu.core_type = #tpu.core_type<tc>} {
    %c0 = arith.constant 0 : index
    %c0_0 = arith.constant 0 : index
    %0 = vector.load %arg0[%c0, %c0_0] : memref<64x128xf32, #tpu.memory_space<vmem>>, vector<64x128xf32>
    %c0_1 = arith.constant 0 : index
    %c0_2 = arith.constant 0 : index
    %c0_3 = arith.constant 0 : index
    %1 = vector.load %arg1[%c0_1, %c0_2, %c0_3] : memref<10x128x128xf32, #tpu.memory_space<vmem>>, vector<1x128x128xf32>
    %2 = vector.shape_cast %1 : vector<1x128x128xf32> to vector<128x128xf32>
    %cst = arith.constant dense<0.000000e+00> : vector<64x128xf32>
    %3 = tpu.matmul %0, %2, %cst {dimension_numbers = #tpu.dot_dimension_numbers<[1], [0], [0], [1], [0, 0, 1, 1], [], []>} : vector<64x128xf32>, vector<128x128xf32>, vector<64x128xf32> -> vector<64x128xf32>
    %c0_4 = arith.constant 0 : index
    %c0_5 = arith.constant 0 : index
    %4 = vector.load %arg2[%c0_4, %c0_5] : memref<8x128xf32, #tpu.memory_space<vmem>>, vector<1x128xf32>
    %5 = vector.broadcast %4 : vector<1x128xf32> to vector<64x128xf32>
    %6 = arith.addf %3, %5 : vector<64x128xf32>
    %cst_6 = arith.constant 0.000000e+00 : f32
    %7 = vector.broadcast %cst_6 : f32 to vector<64x128xf32>
    %8 = arith.maximumf %6, %7 : vector<64x128xf32>
    %c1 = arith.constant 1 : index
    %c0_7 = arith.constant 0 : index
    %c0_8 = arith.constant 0 : index
    %9 = vector.load %arg1[%c1, %c0_7, %c0_8] : memref<10x128x128xf32, #tpu.memory_space<vmem>>, vector<1x128x128xf32>
    %10 = vector.shape_cast %9 : vector<1x128x128xf32> to vector<128x128xf32>
    %cst_9 = arith.constant dense<0.000000e+00> : vector<64x128xf32>
    %11 = tpu.matmul %8, %10, %cst_9 {dimension_numbers = #tpu.dot_dimension_numbers<[1], [0], [0], [1], [0, 0, 1, 1], [], []>} : vector<64x128xf32>, vector<128x128xf32>, vector<64x128xf32> -> vector<64x128xf32>
    %c1_10 = arith.constant 1 : index
    %c0_11 = arith.constant 0 : index
    %12 = vector.load %arg2[%c1_10, %c0_11] : memref<8x128xf32, #tpu.memory_space<vmem>>, vector<1x128xf32>
    %13 = vector.broadcast %12 : vector<1x128xf32> to vector<64x128xf32>
    %14 = arith.addf %11, %13 : vector<64x128xf32>
    %cst_12 = arith.constant 0.000000e+00 : f32
    %15 = vector.broadcast %cst_12 : f32 to vector<64x128xf32>
    %16 = arith.maximumf %14, %15 : vector<64x128xf32>
    %c2 = arith.constant 2 : index
    %c0_13 = arith.constant 0 : index
    %c0_14 = arith.constant 0 : index
    %17 = vector.load %arg1[%c2, %c0_13, %c0_14] : memref<10x128x128xf32, #tpu.memory_space<vmem>>, vector<1x128x128xf32>
    %18 = vector.shape_cast %17 : vector<1x128x128xf32> to vector<128x128xf32>
    %cst_15 = arith.constant dense<0.000000e+00> : vector<64x128xf32>
    %19 = tpu.matmul %16, %18, %cst_15 {dimension_numbers = #tpu.dot_dimension_numbers<[1], [0], [0], [1], [0, 0, 1, 1], [], []>} : vector<64x128xf32>, vector<128x128xf32>, vector<64x128xf32> -> vector<64x128xf32>
    %c2_16 = arith.constant 2 : index
    %c0_17 = arith.constant 0 : index
    %20 = vector.load %arg2[%c2_16, %c0_17] : memref<8x128xf32, #tpu.memory_space<vmem>>, vector<1x128xf32>
    %21 = vector.broadcast %20 : vector<1x128xf32> to vector<64x128xf32>
    %22 = arith.addf %19, %21 : vector<64x128xf32>
    %cst_18 = arith.constant 0.000000e+00 : f32
    %23 = vector.broadcast %cst_18 : f32 to vector<64x128xf32>
    %24 = arith.maximumf %22, %23 : vector<64x128xf32>
    %c3 = arith.constant 3 : index
    %c0_19 = arith.constant 0 : index
    %c0_20 = arith.constant 0 : index
    %25 = vector.load %arg1[%c3, %c0_19, %c0_20] : memref<10x128x128xf32, #tpu.memory_space<vmem>>, vector<1x128x128xf32>
    %26 = vector.shape_cast %25 : vector<1x128x128xf32> to vector<128x128xf32>
    %cst_21 = arith.constant dense<0.000000e+00> : vector<64x128xf32>
    %27 = tpu.matmul %24, %26, %cst_21 {dimension_numbers = #tpu.dot_dimension_numbers<[1], [0], [0], [1], [0, 0, 1, 1], [], []>} : vector<64x128xf32>, vector<128x128xf32>, vector<64x128xf32> -> vector<64x128xf32>
    %c3_22 = arith.constant 3 : index
    %c0_23 = arith.constant 0 : index
    %28 = vector.load %arg2[%c3_22, %c0_23] : memref<8x128xf32, #tpu.memory_space<vmem>>, vector<1x128xf32>
    %29 = vector.broadcast %28 : vector<1x128xf32> to vector<64x128xf32>
    %30 = arith.addf %27, %29 : vector<64x128xf32>
    %c0_24 = arith.constant 0 : index
    %c0_25 = arith.constant 0 : index
    %31 = vector.load %arg4[%c0_24, %c0_25] : memref<64x128xf32, #tpu.memory_space<vmem>>, vector<64x128xf32>
    tpu.vector_store %arg4[%c0_24, %c0_25], %30 {strides = array<i32>} : memref<64x128xf32, #tpu.memory_space<vmem>>, vector<64x128xf32>,
    %c4 = arith.constant 4 : index
    %c0_26 = arith.constant 0 : index
    %32 = vector.load %arg2[%c4, %c0_26] : memref<8x128xf32, #tpu.memory_space<vmem>>, vector<1x128xf32>
    %c0_27 = arith.constant 0 : index
    %c0_28 = arith.constant 0 : index
    %33 = vector.load %arg4[%c0_27, %c0_28] : memref<64x128xf32, #tpu.memory_space<vmem>>, vector<8x128xf32>
    %34 = math.tanh %33 : vector<8x128xf32>
    %cst_29 = arith.constant 0.000000e+00 : f32
    %35 = vector.broadcast %cst_29 : f32 to vector<8x128xf32>
    %c1_i32 = arith.constant 1 : i32
    %c8_i32 = arith.constant 8 : i32
    %36 = arith.muli %c1_i32, %c8_i32 : i32
    %37 = tpu.assume_multiple %36, 8 : i32
    %38 = arith.index_cast %37 : i32 to index
    %c0_30 = arith.constant 0 : index
    %39 = vector.load %arg4[%38, %c0_30] : memref<64x128xf32, #tpu.memory_space<vmem>>, vector<8x128xf32>
    %c4_31 = arith.constant 4 : index
    %c0_32 = arith.constant 0 : index
    %c0_33 = arith.constant 0 : index
    %40 = vector.load %arg1[%c4_31, %c0_32, %c0_33] : memref<10x128x128xf32, #tpu.memory_space<vmem>>, vector<1x128x128xf32>
    %41 = vector.shape_cast %40 : vector<1x128x128xf32> to vector<128x128xf32>
    %cst_34 = arith.constant dense<0.000000e+00> : vector<8x128xf32>
    %42 = tpu.matmul %34, %41, %cst_34 {dimension_numbers = #tpu.dot_dimension_numbers<[1], [0], [0], [1], [0, 0, 1, 1], [], []>} : vector<8x128xf32>, vector<128x128xf32>, vector<8x128xf32> -> vector<8x128xf32>
    %43 = arith.addf %39, %42 : vector<8x128xf32>
    %44 = math.tanh %43 : vector<8x128xf32>
    %c5 = arith.constant 5 : index
    %c0_35 = arith.constant 0 : index
    %c0_36 = arith.constant 0 : index
    %45 = vector.load %arg1[%c5, %c0_35, %c0_36] : memref<10x128x128xf32, #tpu.memory_space<vmem>>, vector<1x128x128xf32>
    %46 = vector.shape_cast %45 : vector<1x128x128xf32> to vector<128x128xf32>
    %cst_37 = arith.constant dense<0.000000e+00> : vector<8x128xf32>
    %47 = tpu.matmul %34, %46, %cst_37 {dimension_numbers = #tpu.dot_dimension_numbers<[1], [0], [0], [1], [0, 0, 1, 1], [], []>} : vector<8x128xf32>, vector<128x128xf32>, vector<8x128xf32> -> vector<8x128xf32>
    %48 = vector.broadcast %32 : vector<1x128xf32> to vector<8x128xf32>
    %49 = arith.addf %47, %48 : vector<8x128xf32>
    %c6 = arith.constant 6 : index
    %c0_38 = arith.constant 0 : index
    %c0_39 = arith.constant 0 : index
    %50 = vector.load %arg1[%c6, %c0_38, %c0_39] : memref<10x128x128xf32, #tpu.memory_space<vmem>>, vector<1x128x128xf32>
    %51 = vector.shape_cast %50 : vector<1x128x128xf32> to vector<128x128xf32>
    %cst_40 = arith.constant dense<0.000000e+00> : vector<8x128xf32>
    %52 = tpu.matmul %35, %51, %cst_40 {dimension_numbers = #tpu.dot_dimension_numbers<[1], [0], [0], [1], [0, 0, 1, 1], [], []>} : vector<8x128xf32>, vector<128x128xf32>, vector<8x128xf32> -> vector<8x128xf32>
    %53 = arith.addf %49, %52 : vector<8x128xf32>
    %54 = math.tanh %53 : vector<8x128xf32>
    %c1_i32_41 = arith.constant 1 : i32
    %55 = arith.subi %c1_i32, %c1_i32_41 : i32
    %c8_i32_42 = arith.constant 8 : i32
    %56 = arith.muli %55, %c8_i32_42 : i32
    %57 = tpu.assume_multiple %56, 8 : i32
    %58 = arith.index_cast %57 : i32 to index
    %c0_43 = arith.constant 0 : index
    %59 = vector.load %arg5[%58, %c0_43] : memref<64x128xf32, #tpu.memory_space<vmem>>, vector<8x128xf32>
    tpu.vector_store %arg5[%58, %c0_43], %54 {strides = array<i32>} : memref<64x128xf32, #tpu.memory_space<vmem>>, vector<8x128xf32>,
    %c2_i32 = arith.constant 2 : i32
    %c8_i32_44 = arith.constant 8 : i32
    %60 = arith.muli %c2_i32, %c8_i32_44 : i32
    %61 = tpu.assume_multiple %60, 8 : i32
    %62 = arith.index_cast %61 : i32 to index
    %c0_45 = arith.constant 0 : index
    %63 = vector.load %arg4[%62, %c0_45] : memref<64x128xf32, #tpu.memory_space<vmem>>, vector<8x128xf32>
    %c4_46 = arith.constant 4 : index
    %c0_47 = arith.constant 0 : index
    %c0_48 = arith.constant 0 : index
    %64 = vector.load %arg1[%c4_46, %c0_47, %c0_48] : memref<10x128x128xf32, #tpu.memory_space<vmem>>, vector<1x128x128xf32>
    %65 = vector.shape_cast %64 : vector<1x128x128xf32> to vector<128x128xf32>
    %cst_49 = arith.constant dense<0.000000e+00> : vector<8x128xf32>
    %66 = tpu.matmul %44, %65, %cst_49 {dimension_numbers = #tpu.dot_dimension_numbers<[1], [0], [0], [1], [0, 0, 1, 1], [], []>} : vector<8x128xf32>, vector<128x128xf32>, vector<8x128xf32> -> vector<8x128xf32>
    %67 = arith.addf %63, %66 : vector<8x128xf32>
    %68 = math.tanh %67 : vector<8x128xf32>
    %c5_50 = arith.constant 5 : index
    %c0_51 = arith.constant 0 : index
    %c0_52 = arith.constant 0 : index
    %69 = vector.load %arg1[%c5_50, %c0_51, %c0_52] : memref<10x128x128xf32, #tpu.memory_space<vmem>>, vector<1x128x128xf32>
    %70 = vector.shape_cast %69 : vector<1x128x128xf32> to vector<128x128xf32>
    %cst_53 = arith.constant dense<0.000000e+00> : vector<8x128xf32>
    %71 = tpu.matmul %44, %70, %cst_53 {dimension_numbers = #tpu.dot_dimension_numbers<[1], [0], [0], [1], [0, 0, 1, 1], [], []>} : vector<8x128xf32>, vector<128x128xf32>, vector<8x128xf32> -> vector<8x128xf32>
    %72 = vector.broadcast %32 : vector<1x128xf32> to vector<8x128xf32>
    %73 = arith.addf %71, %72 : vector<8x128xf32>
    %c6_54 = arith.constant 6 : index
    %c0_55 = arith.constant 0 : index
    %c0_56 = arith.constant 0 : index
    %74 = vector.load %arg1[%c6_54, %c0_55, %c0_56] : memref<10x128x128xf32, #tpu.memory_space<vmem>>, vector<1x128x128xf32>
    %75 = vector.shape_cast %74 : vector<1x128x128xf32> to vector<128x128xf32>
    %cst_57 = arith.constant dense<0.000000e+00> : vector<8x128xf32>
    %76 = tpu.matmul %54, %75, %cst_57 {dimension_numbers = #tpu.dot_dimension_numbers<[1], [0], [0], [1], [0, 0, 1, 1], [], []>} : vector<8x128xf32>, vector<128x128xf32>, vector<8x128xf32> -> vector<8x128xf32>
    %77 = arith.addf %73, %76 : vector<8x128xf32>
    %78 = math.tanh %77 : vector<8x128xf32>
    %c1_i32_58 = arith.constant 1 : i32
    %79 = arith.subi %c2_i32, %c1_i32_58 : i32
    %c8_i32_59 = arith.constant 8 : i32
    %80 = arith.muli %79, %c8_i32_59 : i32
    %81 = tpu.assume_multiple %80, 8 : i32
    %82 = arith.index_cast %81 : i32 to index
    %c0_60 = arith.constant 0 : index
    %83 = vector.load %arg5[%82, %c0_60] : memref<64x128xf32, #tpu.memory_space<vmem>>, vector<8x128xf32>
    tpu.vector_store %arg5[%82, %c0_60], %78 {strides = array<i32>} : memref<64x128xf32, #tpu.memory_space<vmem>>, vector<8x128xf32>,
    %c3_i32 = arith.constant 3 : i32
    %c8_i32_61 = arith.constant 8 : i32
    %84 = arith.muli %c3_i32, %c8_i32_61 : i32
    %85 = tpu.assume_multiple %84, 8 : i32
    %86 = arith.index_cast %85 : i32 to index
    %c0_62 = arith.constant 0 : index
    %87 = vector.load %arg4[%86, %c0_62] : memref<64x128xf32, #tpu.memory_space<vmem>>, vector<8x128xf32>
    %c4_63 = arith.constant 4 : index
    %c0_64 = arith.constant 0 : index
    %c0_65 = arith.constant 0 : index
    %88 = vector.load %arg1[%c4_63, %c0_64, %c0_65] : memref<10x128x128xf32, #tpu.memory_space<vmem>>, vector<1x128x128xf32>
    %89 = vector.shape_cast %88 : vector<1x128x128xf32> to vector<128x128xf32>
    %cst_66 = arith.constant dense<0.000000e+00> : vector<8x128xf32>
    %90 = tpu.matmul %68, %89, %cst_66 {dimension_numbers = #tpu.dot_dimension_numbers<[1], [0], [0], [1], [0, 0, 1, 1], [], []>} : vector<8x128xf32>, vector<128x128xf32>, vector<8x128xf32> -> vector<8x128xf32>
    %91 = arith.addf %87, %90 : vector<8x128xf32>
    %92 = math.tanh %91 : vector<8x128xf32>
    %c5_67 = arith.constant 5 : index
    %c0_68 = arith.constant 0 : index
    %c0_69 = arith.constant 0 : index
    %93 = vector.load %arg1[%c5_67, %c0_68, %c0_69] : memref<10x128x128xf32, #tpu.memory_space<vmem>>, vector<1x128x128xf32>
    %94 = vector.shape_cast %93 : vector<1x128x128xf32> to vector<128x128xf32>
    %cst_70 = arith.constant dense<0.000000e+00> : vector<8x128xf32>
    %95 = tpu.matmul %68, %94, %cst_70 {dimension_numbers = #tpu.dot_dimension_numbers<[1], [0], [0], [1], [0, 0, 1, 1], [], []>} : vector<8x128xf32>, vector<128x128xf32>, vector<8x128xf32> -> vector<8x128xf32>
    %96 = vector.broadcast %32 : vector<1x128xf32> to vector<8x128xf32>
    %97 = arith.addf %95, %96 : vector<8x128xf32>
    %c6_71 = arith.constant 6 : index
    %c0_72 = arith.constant 0 : index
    %c0_73 = arith.constant 0 : index
    %98 = vector.load %arg1[%c6_71, %c0_72, %c0_73] : memref<10x128x128xf32, #tpu.memory_space<vmem>>, vector<1x128x128xf32>
    %99 = vector.shape_cast %98 : vector<1x128x128xf32> to vector<128x128xf32>
    %cst_74 = arith.constant dense<0.000000e+00> : vector<8x128xf32>
    %100 = tpu.matmul %78, %99, %cst_74 {dimension_numbers = #tpu.dot_dimension_numbers<[1], [0], [0], [1], [0, 0, 1, 1], [], []>} : vector<8x128xf32>, vector<128x128xf32>, vector<8x128xf32> -> vector<8x128xf32>
    %101 = arith.addf %97, %100 : vector<8x128xf32>
    %102 = math.tanh %101 : vector<8x128xf32>
    %c1_i32_75 = arith.constant 1 : i32
    %103 = arith.subi %c3_i32, %c1_i32_75 : i32
    %c8_i32_76 = arith.constant 8 : i32
    %104 = arith.muli %103, %c8_i32_76 : i32
    %105 = tpu.assume_multiple %104, 8 : i32
    %106 = arith.index_cast %105 : i32 to index
    %c0_77 = arith.constant 0 : index
    %107 = vector.load %arg5[%106, %c0_77] : memref<64x128xf32, #tpu.memory_space<vmem>>, vector<8x128xf32>
    tpu.vector_store %arg5[%106, %c0_77], %102 {strides = array<i32>} : memref<64x128xf32, #tpu.memory_space<vmem>>, vector<8x128xf32>,
    %c4_i32 = arith.constant 4 : i32
    %c8_i32_78 = arith.constant 8 : i32
    %108 = arith.muli %c4_i32, %c8_i32_78 : i32
    %109 = tpu.assume_multiple %108, 8 : i32
    %110 = arith.index_cast %109 : i32 to index
    %c0_79 = arith.constant 0 : index
    %111 = vector.load %arg4[%110, %c0_79] : memref<64x128xf32, #tpu.memory_space<vmem>>, vector<8x128xf32>
    %c4_80 = arith.constant 4 : index
    %c0_81 = arith.constant 0 : index
    %c0_82 = arith.constant 0 : index
    %112 = vector.load %arg1[%c4_80, %c0_81, %c0_82] : memref<10x128x128xf32, #tpu.memory_space<vmem>>, vector<1x128x128xf32>
    %113 = vector.shape_cast %112 : vector<1x128x128xf32> to vector<128x128xf32>
    %cst_83 = arith.constant dense<0.000000e+00> : vector<8x128xf32>
    %114 = tpu.matmul %92, %113, %cst_83 {dimension_numbers = #tpu.dot_dimension_numbers<[1], [0], [0], [1], [0, 0, 1, 1], [], []>} : vector<8x128xf32>, vector<128x128xf32>, vector<8x128xf32> -> vector<8x128xf32>
    %115 = arith.addf %111, %114 : vector<8x128xf32>
    %116 = math.tanh %115 : vector<8x128xf32>
    %c5_84 = arith.constant 5 : index
    %c0_85 = arith.constant 0 : index
    %c0_86 = arith.constant 0 : index
    %117 = vector.load %arg1[%c5_84, %c0_85, %c0_86] : memref<10x128x128xf32, #tpu.memory_space<vmem>>, vector<1x128x128xf32>
    %118 = vector.shape_cast %117 : vector<1x128x128xf32> to vector<128x128xf32>
    %cst_87 = arith.constant dense<0.000000e+00> : vector<8x128xf32>
    %119 = tpu.matmul %92, %118, %cst_87 {dimension_numbers = #tpu.dot_dimension_numbers<[1], [0], [0], [1], [0, 0, 1, 1], [], []>} : vector<8x128xf32>, vector<128x128xf32>, vector<8x128xf32> -> vector<8x128xf32>
    %120 = vector.broadcast %32 : vector<1x128xf32> to vector<8x128xf32>
    %121 = arith.addf %119, %120 : vector<8x128xf32>
    %c6_88 = arith.constant 6 : index
    %c0_89 = arith.constant 0 : index
    %c0_90 = arith.constant 0 : index
    %122 = vector.load %arg1[%c6_88, %c0_89, %c0_90] : memref<10x128x128xf32, #tpu.memory_space<vmem>>, vector<1x128x128xf32>
    %123 = vector.shape_cast %122 : vector<1x128x128xf32> to vector<128x128xf32>
    %cst_91 = arith.constant dense<0.000000e+00> : vector<8x128xf32>
    %124 = tpu.matmul %102, %123, %cst_91 {dimension_numbers = #tpu.dot_dimension_numbers<[1], [0], [0], [1], [0, 0, 1, 1], [], []>} : vector<8x128xf32>, vector<128x128xf32>, vector<8x128xf32> -> vector<8x128xf32>
    %125 = arith.addf %121, %124 : vector<8x128xf32>
    %126 = math.tanh %125 : vector<8x128xf32>
    %c1_i32_92 = arith.constant 1 : i32
    %127 = arith.subi %c4_i32, %c1_i32_92 : i32
    %c8_i32_93 = arith.constant 8 : i32
    %128 = arith.muli %127, %c8_i32_93 : i32
    %129 = tpu.assume_multiple %128, 8 : i32
    %130 = arith.index_cast %129 : i32 to index
    %c0_94 = arith.constant 0 : index
    %131 = vector.load %arg5[%130, %c0_94] : memref<64x128xf32, #tpu.memory_space<vmem>>, vector<8x128xf32>
    tpu.vector_store %arg5[%130, %c0_94], %126 {strides = array<i32>} : memref<64x128xf32, #tpu.memory_space<vmem>>, vector<8x128xf32>,
    %c5_i32 = arith.constant 5 : i32
    %c8_i32_95 = arith.constant 8 : i32
    %132 = arith.muli %c5_i32, %c8_i32_95 : i32
    %133 = tpu.assume_multiple %132, 8 : i32
    %134 = arith.index_cast %133 : i32 to index
    %c0_96 = arith.constant 0 : index
    %135 = vector.load %arg4[%134, %c0_96] : memref<64x128xf32, #tpu.memory_space<vmem>>, vector<8x128xf32>
    %c4_97 = arith.constant 4 : index
    %c0_98 = arith.constant 0 : index
    %c0_99 = arith.constant 0 : index
    %136 = vector.load %arg1[%c4_97, %c0_98, %c0_99] : memref<10x128x128xf32, #tpu.memory_space<vmem>>, vector<1x128x128xf32>
    %137 = vector.shape_cast %136 : vector<1x128x128xf32> to vector<128x128xf32>
    %cst_100 = arith.constant dense<0.000000e+00> : vector<8x128xf32>
    %138 = tpu.matmul %116, %137, %cst_100 {dimension_numbers = #tpu.dot_dimension_numbers<[1], [0], [0], [1], [0, 0, 1, 1], [], []>} : vector<8x128xf32>, vector<128x128xf32>, vector<8x128xf32> -> vector<8x128xf32>
    %139 = arith.addf %135, %138 : vector<8x128xf32>
    %140 = math.tanh %139 : vector<8x128xf32>
    %c5_101 = arith.constant 5 : index
    %c0_102 = arith.constant 0 : index
    %c0_103 = arith.constant 0 : index
    %141 = vector.load %arg1[%c5_101, %c0_102, %c0_103] : memref<10x128x128xf32, #tpu.memory_space<vmem>>, vector<1x128x128xf32>
    %142 = vector.shape_cast %141 : vector<1x128x128xf32> to vector<128x128xf32>
    %cst_104 = arith.constant dense<0.000000e+00> : vector<8x128xf32>
    %143 = tpu.matmul %116, %142, %cst_104 {dimension_numbers = #tpu.dot_dimension_numbers<[1], [0], [0], [1], [0, 0, 1, 1], [], []>} : vector<8x128xf32>, vector<128x128xf32>, vector<8x128xf32> -> vector<8x128xf32>
    %144 = vector.broadcast %32 : vector<1x128xf32> to vector<8x128xf32>
    %145 = arith.addf %143, %144 : vector<8x128xf32>
    %c6_105 = arith.constant 6 : index
    %c0_106 = arith.constant 0 : index
    %c0_107 = arith.constant 0 : index
    %146 = vector.load %arg1[%c6_105, %c0_106, %c0_107] : memref<10x128x128xf32, #tpu.memory_space<vmem>>, vector<1x128x128xf32>
    %147 = vector.shape_cast %146 : vector<1x128x128xf32> to vector<128x128xf32>
    %cst_108 = arith.constant dense<0.000000e+00> : vector<8x128xf32>
    %148 = tpu.matmul %126, %147, %cst_108 {dimension_numbers = #tpu.dot_dimension_numbers<[1], [0], [0], [1], [0, 0, 1, 1], [], []>} : vector<8x128xf32>, vector<128x128xf32>, vector<8x128xf32> -> vector<8x128xf32>
    %149 = arith.addf %145, %148 : vector<8x128xf32>
    %150 = math.tanh %149 : vector<8x128xf32>
    %c1_i32_109 = arith.constant 1 : i32
    %151 = arith.subi %c5_i32, %c1_i32_109 : i32
    %c8_i32_110 = arith.constant 8 : i32
    %152 = arith.muli %151, %c8_i32_110 : i32
    %153 = tpu.assume_multiple %152, 8 : i32
    %154 = arith.index_cast %153 : i32 to index
    %c0_111 = arith.constant 0 : index
    %155 = vector.load %arg5[%154, %c0_111] : memref<64x128xf32, #tpu.memory_space<vmem>>, vector<8x128xf32>
    tpu.vector_store %arg5[%154, %c0_111], %150 {strides = array<i32>} : memref<64x128xf32, #tpu.memory_space<vmem>>, vector<8x128xf32>,
    %c6_i32 = arith.constant 6 : i32
    %c8_i32_112 = arith.constant 8 : i32
    %156 = arith.muli %c6_i32, %c8_i32_112 : i32
    %157 = tpu.assume_multiple %156, 8 : i32
    %158 = arith.index_cast %157 : i32 to index
    %c0_113 = arith.constant 0 : index
    %159 = vector.load %arg4[%158, %c0_113] : memref<64x128xf32, #tpu.memory_space<vmem>>, vector<8x128xf32>
    %c4_114 = arith.constant 4 : index
    %c0_115 = arith.constant 0 : index
    %c0_116 = arith.constant 0 : index
    %160 = vector.load %arg1[%c4_114, %c0_115, %c0_116] : memref<10x128x128xf32, #tpu.memory_space<vmem>>, vector<1x128x128xf32>
    %161 = vector.shape_cast %160 : vector<1x128x128xf32> to vector<128x128xf32>
    %cst_117 = arith.constant dense<0.000000e+00> : vector<8x128xf32>
    %162 = tpu.matmul %140, %161, %cst_117 {dimension_numbers = #tpu.dot_dimension_numbers<[1], [0], [0], [1], [0, 0, 1, 1], [], []>} : vector<8x128xf32>, vector<128x128xf32>, vector<8x128xf32> -> vector<8x128xf32>
    %163 = arith.addf %159, %162 : vector<8x128xf32>
    %164 = math.tanh %163 : vector<8x128xf32>
    %c5_118 = arith.constant 5 : index
    %c0_119 = arith.constant 0 : index
    %c0_120 = arith.constant 0 : index
    %165 = vector.load %arg1[%c5_118, %c0_119, %c0_120] : memref<10x128x128xf32, #tpu.memory_space<vmem>>, vector<1x128x128xf32>
    %166 = vector.shape_cast %165 : vector<1x128x128xf32> to vector<128x128xf32>
    %cst_121 = arith.constant dense<0.000000e+00> : vector<8x128xf32>
    %167 = tpu.matmul %140, %166, %cst_121 {dimension_numbers = #tpu.dot_dimension_numbers<[1], [0], [0], [1], [0, 0, 1, 1], [], []>} : vector<8x128xf32>, vector<128x128xf32>, vector<8x128xf32> -> vector<8x128xf32>
    %168 = vector.broadcast %32 : vector<1x128xf32> to vector<8x128xf32>
    %169 = arith.addf %167, %168 : vector<8x128xf32>
    %c6_122 = arith.constant 6 : index
    %c0_123 = arith.constant 0 : index
    %c0_124 = arith.constant 0 : index
    %170 = vector.load %arg1[%c6_122, %c0_123, %c0_124] : memref<10x128x128xf32, #tpu.memory_space<vmem>>, vector<1x128x128xf32>
    %171 = vector.shape_cast %170 : vector<1x128x128xf32> to vector<128x128xf32>
    %cst_125 = arith.constant dense<0.000000e+00> : vector<8x128xf32>
    %172 = tpu.matmul %150, %171, %cst_125 {dimension_numbers = #tpu.dot_dimension_numbers<[1], [0], [0], [1], [0, 0, 1, 1], [], []>} : vector<8x128xf32>, vector<128x128xf32>, vector<8x128xf32> -> vector<8x128xf32>
    %173 = arith.addf %169, %172 : vector<8x128xf32>
    %174 = math.tanh %173 : vector<8x128xf32>
    %c1_i32_126 = arith.constant 1 : i32
    %175 = arith.subi %c6_i32, %c1_i32_126 : i32
    %c8_i32_127 = arith.constant 8 : i32
    %176 = arith.muli %175, %c8_i32_127 : i32
    %177 = tpu.assume_multiple %176, 8 : i32
    %178 = arith.index_cast %177 : i32 to index
    %c0_128 = arith.constant 0 : index
    %179 = vector.load %arg5[%178, %c0_128] : memref<64x128xf32, #tpu.memory_space<vmem>>, vector<8x128xf32>
    tpu.vector_store %arg5[%178, %c0_128], %174 {strides = array<i32>} : memref<64x128xf32, #tpu.memory_space<vmem>>, vector<8x128xf32>,
    %c7_i32 = arith.constant 7 : i32
    %c8_i32_129 = arith.constant 8 : i32
    %180 = arith.muli %c7_i32, %c8_i32_129 : i32
    %181 = tpu.assume_multiple %180, 8 : i32
    %182 = arith.index_cast %181 : i32 to index
    %c0_130 = arith.constant 0 : index
    %183 = vector.load %arg4[%182, %c0_130] : memref<64x128xf32, #tpu.memory_space<vmem>>, vector<8x128xf32>
    %c4_131 = arith.constant 4 : index
    %c0_132 = arith.constant 0 : index
    %c0_133 = arith.constant 0 : index
    %184 = vector.load %arg1[%c4_131, %c0_132, %c0_133] : memref<10x128x128xf32, #tpu.memory_space<vmem>>, vector<1x128x128xf32>
    %185 = vector.shape_cast %184 : vector<1x128x128xf32> to vector<128x128xf32>
    %cst_134 = arith.constant dense<0.000000e+00> : vector<8x128xf32>
    %186 = tpu.matmul %164, %185, %cst_134 {dimension_numbers = #tpu.dot_dimension_numbers<[1], [0], [0], [1], [0, 0, 1, 1], [], []>} : vector<8x128xf32>, vector<128x128xf32>, vector<8x128xf32> -> vector<8x128xf32>
    %187 = arith.addf %183, %186 : vector<8x128xf32>
    %188 = math.tanh %187 : vector<8x128xf32>
    %c5_135 = arith.constant 5 : index
    %c0_136 = arith.constant 0 : index
    %c0_137 = arith.constant 0 : index
    %189 = vector.load %arg1[%c5_135, %c0_136, %c0_137] : memref<10x128x128xf32, #tpu.memory_space<vmem>>, vector<1x128x128xf32>
    %190 = vector.shape_cast %189 : vector<1x128x128xf32> to vector<128x128xf32>
    %cst_138 = arith.constant dense<0.000000e+00> : vector<8x128xf32>
    %191 = tpu.matmul %164, %190, %cst_138 {dimension_numbers = #tpu.dot_dimension_numbers<[1], [0], [0], [1], [0, 0, 1, 1], [], []>} : vector<8x128xf32>, vector<128x128xf32>, vector<8x128xf32> -> vector<8x128xf32>
    %192 = vector.broadcast %32 : vector<1x128xf32> to vector<8x128xf32>
    %193 = arith.addf %191, %192 : vector<8x128xf32>
    %c6_139 = arith.constant 6 : index
    %c0_140 = arith.constant 0 : index
    %c0_141 = arith.constant 0 : index
    %194 = vector.load %arg1[%c6_139, %c0_140, %c0_141] : memref<10x128x128xf32, #tpu.memory_space<vmem>>, vector<1x128x128xf32>
    %195 = vector.shape_cast %194 : vector<1x128x128xf32> to vector<128x128xf32>
    %cst_142 = arith.constant dense<0.000000e+00> : vector<8x128xf32>
    %196 = tpu.matmul %174, %195, %cst_142 {dimension_numbers = #tpu.dot_dimension_numbers<[1], [0], [0], [1], [0, 0, 1, 1], [], []>} : vector<8x128xf32>, vector<128x128xf32>, vector<8x128xf32> -> vector<8x128xf32>
    %197 = arith.addf %193, %196 : vector<8x128xf32>
    %198 = math.tanh %197 : vector<8x128xf32>
    %c1_i32_143 = arith.constant 1 : i32
    %199 = arith.subi %c7_i32, %c1_i32_143 : i32
    %c8_i32_144 = arith.constant 8 : i32
    %200 = arith.muli %199, %c8_i32_144 : i32
    %201 = tpu.assume_multiple %200, 8 : i32
    %202 = arith.index_cast %201 : i32 to index
    %c0_145 = arith.constant 0 : index
    %203 = vector.load %arg5[%202, %c0_145] : memref<64x128xf32, #tpu.memory_space<vmem>>, vector<8x128xf32>
    tpu.vector_store %arg5[%202, %c0_145], %198 {strides = array<i32>} : memref<64x128xf32, #tpu.memory_space<vmem>>, vector<8x128xf32>,
    %c7_i32_146 = arith.constant 7 : i32
    %c5_147 = arith.constant 5 : index
    %c0_148 = arith.constant 0 : index
    %c0_149 = arith.constant 0 : index
    %204 = vector.load %arg1[%c5_147, %c0_148, %c0_149] : memref<10x128x128xf32, #tpu.memory_space<vmem>>, vector<1x128x128xf32>
    %205 = vector.shape_cast %204 : vector<1x128x128xf32> to vector<128x128xf32>
    %cst_150 = arith.constant dense<0.000000e+00> : vector<8x128xf32>
    %206 = tpu.matmul %188, %205, %cst_150 {dimension_numbers = #tpu.dot_dimension_numbers<[1], [0], [0], [1], [0, 0, 1, 1], [], []>} : vector<8x128xf32>, vector<128x128xf32>, vector<8x128xf32> -> vector<8x128xf32>
    %207 = vector.broadcast %32 : vector<1x128xf32> to vector<8x128xf32>
    %208 = arith.addf %206, %207 : vector<8x128xf32>
    %c6_151 = arith.constant 6 : index
    %c0_152 = arith.constant 0 : index
    %c0_153 = arith.constant 0 : index
    %209 = vector.load %arg1[%c6_151, %c0_152, %c0_153] : memref<10x128x128xf32, #tpu.memory_space<vmem>>, vector<1x128x128xf32>
    %210 = vector.shape_cast %209 : vector<1x128x128xf32> to vector<128x128xf32>
    %cst_154 = arith.constant dense<0.000000e+00> : vector<8x128xf32>
    %211 = tpu.matmul %198, %210, %cst_154 {dimension_numbers = #tpu.dot_dimension_numbers<[1], [0], [0], [1], [0, 0, 1, 1], [], []>} : vector<8x128xf32>, vector<128x128xf32>, vector<8x128xf32> -> vector<8x128xf32>
    %212 = arith.addf %208, %211 : vector<8x128xf32>
    %213 = math.tanh %212 : vector<8x128xf32>
    %c56 = arith.constant 56 : index
    %c0_155 = arith.constant 0 : index
    %214 = vector.load %arg5[%c56, %c0_155] : memref<64x128xf32, #tpu.memory_space<vmem>>, vector<8x128xf32>
    tpu.vector_store %arg5[%c56, %c0_155], %213 {strides = array<i32>} : memref<64x128xf32, #tpu.memory_space<vmem>>, vector<8x128xf32>,
    %c0_156 = arith.constant 0 : index
    %c0_157 = arith.constant 0 : index
    %215 = vector.load %arg5[%c0_156, %c0_157] : memref<64x128xf32, #tpu.memory_space<vmem>>, vector<64x128xf32>
    %cst_158 = arith.constant 0.000000e+00 : f32
    %216 = vector.broadcast %cst_158 : f32 to vector<64x128xf32>
    %217 = arith.maximumf %215, %216 : vector<64x128xf32>
    %c7 = arith.constant 7 : index
    %c0_159 = arith.constant 0 : index
    %c0_160 = arith.constant 0 : index
    %218 = vector.load %arg1[%c7, %c0_159, %c0_160] : memref<10x128x128xf32, #tpu.memory_space<vmem>>, vector<1x128x128xf32>
    %219 = vector.shape_cast %218 : vector<1x128x128xf32> to vector<128x128xf32>
    %cst_161 = arith.constant dense<0.000000e+00> : vector<64x128xf32>
    %220 = tpu.matmul %217, %219, %cst_161 {dimension_numbers = #tpu.dot_dimension_numbers<[1], [0], [0], [1], [0, 0, 1, 1], [], []>} : vector<64x128xf32>, vector<128x128xf32>, vector<64x128xf32> -> vector<64x128xf32>
    %c5_162 = arith.constant 5 : index
    %c0_163 = arith.constant 0 : index
    %221 = vector.load %arg2[%c5_162, %c0_163] : memref<8x128xf32, #tpu.memory_space<vmem>>, vector<1x128xf32>
    %222 = vector.broadcast %221 : vector<1x128xf32> to vector<64x128xf32>
    %223 = arith.addf %220, %222 : vector<64x128xf32>
    %cst_164 = arith.constant 0.000000e+00 : f32
    %224 = vector.broadcast %cst_164 : f32 to vector<64x128xf32>
    %225 = arith.maximumf %223, %224 : vector<64x128xf32>
    %c8 = arith.constant 8 : index
    %c0_165 = arith.constant 0 : index
    %c0_166 = arith.constant 0 : index
    %226 = vector.load %arg1[%c8, %c0_165, %c0_166] : memref<10x128x128xf32, #tpu.memory_space<vmem>>, vector<1x128x128xf32>
    %227 = vector.shape_cast %226 : vector<1x128x128xf32> to vector<128x128xf32>
    %cst_167 = arith.constant dense<0.000000e+00> : vector<64x128xf32>
    %228 = tpu.matmul %225, %227, %cst_167 {dimension_numbers = #tpu.dot_dimension_numbers<[1], [0], [0], [1], [0, 0, 1, 1], [], []>} : vector<64x128xf32>, vector<128x128xf32>, vector<64x128xf32> -> vector<64x128xf32>
    %c6_168 = arith.constant 6 : index
    %c0_169 = arith.constant 0 : index
    %229 = vector.load %arg2[%c6_168, %c0_169] : memref<8x128xf32, #tpu.memory_space<vmem>>, vector<1x128xf32>
    %230 = vector.broadcast %229 : vector<1x128xf32> to vector<64x128xf32>
    %231 = arith.addf %228, %230 : vector<64x128xf32>
    %cst_170 = arith.constant 0.000000e+00 : f32
    %232 = vector.broadcast %cst_170 : f32 to vector<64x128xf32>
    %233 = arith.maximumf %231, %232 : vector<64x128xf32>
    %c9 = arith.constant 9 : index
    %c0_171 = arith.constant 0 : index
    %c0_172 = arith.constant 0 : index
    %234 = vector.load %arg1[%c9, %c0_171, %c0_172] : memref<10x128x128xf32, #tpu.memory_space<vmem>>, vector<1x128x128xf32>
    %235 = vector.shape_cast %234 : vector<1x128x128xf32> to vector<128x128xf32>
    %cst_173 = arith.constant dense<0.000000e+00> : vector<64x128xf32>
    %236 = tpu.matmul %233, %235, %cst_173 {dimension_numbers = #tpu.dot_dimension_numbers<[1], [0], [0], [1], [0, 0, 1, 1], [], []>} : vector<64x128xf32>, vector<128x128xf32>, vector<64x128xf32> -> vector<64x128xf32>
    %c7_174 = arith.constant 7 : index
    %c0_175 = arith.constant 0 : index
    %237 = vector.load %arg2[%c7_174, %c0_175] : memref<8x128xf32, #tpu.memory_space<vmem>>, vector<1x128xf32>
    %238 = vector.broadcast %237 : vector<1x128xf32> to vector<64x128xf32>
    %239 = arith.addf %236, %238 : vector<64x128xf32>
    %c0_176 = arith.constant 0 : index
    %c0_177 = arith.constant 0 : index
    %240 = vector.load %arg3[%c0_176, %c0_177] : memref<64x128xf32, #tpu.memory_space<vmem>>, vector<64x128xf32>
    tpu.vector_store %arg3[%c0_176, %c0_177], %239 {strides = array<i32>} : memref<64x128xf32, #tpu.memory_space<vmem>>, vector<64x128xf32>,
    return
  }
}

</mosaic_0001>

<bundles_post_ra>
// kernel: tpu_custom_call.1
= control target key start
LH: loop header
LB: loop body
LE: loop exit
PB: predicated region body
PF: predicated region fallthrough
CT: control target
= control target key end

     0   :  { %8 = vsyncpa [#allocation5], 0  ;;  %s6001_s0 = inlined_call_operand.hbm [shape: f32[64,128], index: 0, kind: input, shape index: {}]   ;;  %s6002_s1 = inlined_call_operand.hbm [shape: f32[10,128,128], index: 1, kind: input, shape index: {}]   ;;  %s6003_s2 = inlined_call_operand.hbm [shape: f32[8,128], index: 2, kind: input, shape index: {}]   ;;  %s6004_s3 = inlined_call_operand.hbm [shape: f32[64,128], index: 3, kind: output, shape index: {}]  }
   0x1   :  { %9 = vsyncpa [#allocation8], 0 }
   0x2   :  { %10 = vsyncpa [#allocation6], 0  ;;  %s4894_s12 = smov [#allocation7]   ;;  %s4895_s14 = smov [#allocation4]  }
   0x3   :  { %s28_s13 = sshll.u32 %s4894_s12, 4  ;;  %s16_s15 = sshll.u32 %s4895_s14, 4  ;;  %s29_s13 = int_to_ptr.vmem [resolvable:$true] %s28_s13  ;;  %s17_s15 = int_to_ptr.vmem [resolvable:$true] %s16_s15 }
   0x4   :  { %s4816_s16 = scalar_lea.vmem %s29_s13, 20480  ;;  %p4821_p1 = scmp.lt.s32.totalorder %s29_s13, %s29_s13 }
   0x5   :  { %p4817_p0 = scmp.ne.s32.totalorder %s29_s13, %s4816_s16  ;;  %p4822_p2 = scmp.lt.s32.totalorder %s4816_s16, %s4816_s16 }
   0x7   :  { %p4823_p3 = por %p4822_p2, %p4821_p1 }
   0x9   :  { %p4824_p4 = pnand %p4823_p3, %p4817_p0 }
   0xb   :  { %4827 = shalt.err (!%p4824_p4)
}
   0xc   :  { %s4896_s17 = smov 128   ;;  %s4897_s18 = smov 8  }
   0xd   :  { %34 = dma.hbm_to_vmem [thread:$0]  %s6002_s1, 20480, %s29_s13, [#allocation8], %s4896_s17, %s4896_s17, %s4897_s18  }
   0xe   :  { %s4836_s21 = scalar_lea.vmem %s17_s15, 1024  ;;  %p4841_p6 = scmp.lt.s32.totalorder %s17_s15, %s17_s15 }
   0xf   :  { %p4837_p5 = scmp.ne.s32.totalorder %s17_s15, %s4836_s21  ;;  %p4842_p7 = scmp.lt.s32.totalorder %s4836_s21, %s4836_s21 }
  0x11   :  { %p4843_p8 = por %p4842_p7, %p4841_p6 }
  0x13   :  { %p4844_p9 = pnand %p4843_p8, %p4837_p5 }
  0x15   :  { %4847 = shalt.err (!%p4844_p9)
}
  0x16   :  { %22 = dma.hbm_to_vmem [thread:$0]  %s6001_s0, 1024, %s17_s15, [#allocation5], %s4896_s17, %s4896_s17, %s4897_s18  }
  0x17   :  { %s4898_s24 = smov [#allocation9]  }
  0x18   :  { %s41_s25 = sshll.u32 %s4898_s24, 4  ;;  %s42_s25 = int_to_ptr.vmem [resolvable:$true] %s41_s25 }
  0x19   :  { %s4856_s26 = scalar_lea.vmem %s42_s25, 128  ;;  %p4861_p11 = scmp.lt.s32.totalorder %s42_s25, %s42_s25 }
  0x1a   :  { %p4857_p10 = scmp.ne.s32.totalorder %s42_s25, %s4856_s26  ;;  %p4862_p12 = scmp.lt.s32.totalorder %s4856_s26, %s4856_s26 }
  0x1c   :  { %p4863_p13 = por %p4862_p12, %p4861_p11 }
  0x1e   :  { %p4864_p0 = pnand %p4863_p13, %p4857_p10 }
  0x20   :  { %4867 = shalt.err (!%p4864_p0)
}
  0x21   :  { %44 = dma.hbm_to_vmem [thread:$0]  %s6003_s2, 128, %s42_s25, [#allocation8]  }
  0x22   :  { %4888 = dma.done.wait [#allocation5], 1024  }
  0x23   :  { %4889 = vsyncadd [#allocation5], 4294966272 }
  0x24   :  { %4890 = dma.done.wait [#allocation8], 20608  }
  0x25   :  { %4891 = vsyncadd [#allocation8], 4294946688  ;;  %v77_v0 = vld [vmem:[#allocation7 + $0x78] sm:$0xff]  ;;  %v76_v1 = vld [vmem:[#allocation7 + $0x70] sm:$0xff]  ;;  %vm4900_vm0 = vmmov 0   ;;  %s4901_s0 = smov [#allocation10]  }
  0x26   :  { %3653 = vmatprep.subr.mxu0 %v77_v0  ;;  %v75_v2 = vld [vmem:[#allocation7 + $0x68] sm:$0xff]  ;;  %v74_v3 = vld [vmem:[#allocation7 + $0x60] sm:$0xff]  ;;  %v73_v5 = vld [vmem:[#allocation7 + $0x58] sm:$0xff]  ;;  %s3073_s2 = sshll.u32 %s4901_s0, 4  ;;  %s3074_s2 = int_to_ptr.vmem [resolvable:$true] %s3073_s2 }
  0x27   :  { %3654 = vmatpush3.msra.mxu0 %v77_v0  ;;  %v54_v4 = vld [vmem:[#allocation4] sm:$0xff]  ;;  %v212_v6 = vld [vmem:[#allocation7 + $0xf8] sm:$0xff]  ;;  %v211_v7 = vld [vmem:[#allocation7 + $0xf0] sm:$0xff]  ;;  %s4868_s28 = scalar_lea.vmem %s3074_s2, 1024  ;;  %p4873_p2 = scmp.lt.s32.totalorder %s3074_s2, %s3074_s2 }
  0x28   :  { %3655 = vmatprep.subr.mxu0 %v76_v1  ;;  %3685 = vmatprep.mubr.f32.mxu0 %v54_v4  ;;  %v72_v8 = vld [vmem:[#allocation7 + $0x50] sm:$0xff]  ;;  %v210_v9 = vld [vmem:[#allocation7 + $0xe8] sm:$0xff]  ;;  %v209_v11 = vld [vmem:[#allocation7 + $0xe0] sm:$0xff]  ;;  %p4869_p1 = scmp.ne.s32.totalorder %s3074_s2, %s4868_s28  ;;  %p4874_p3 = scmp.lt.s32.totalorder %s4868_s28, %s4868_s28 }
  0x29   :  { %3656 = vmatpush3.msra.mxu0 %v76_v1  ;;  %3697 = vmatprep.subr.mxu1 %v212_v6  ;;  %v71_v10 = vld [vmem:[#allocation7 + $0x48] sm:$0xff]  ;;  %v70_v12 = vld [vmem:[#allocation7 + $0x40] sm:$0xff]  ;;  %v208_v13 = vld [vmem:[#allocation7 + $0xd8] sm:$0xff] }
  0x2a   :  { %3657 = vmatprep.subr.mxu0 %v75_v2  ;;  %3698 = vmatpush3.msra.mxu1 %v212_v6  ;;  %v69_v14 = vld [vmem:[#allocation7 + $0x38] sm:$0xff]  ;;  %v207_v15 = vld [vmem:[#allocation7 + $0xd0] sm:$0xff]  ;;  %v206_v17 = vld [vmem:[#allocation7 + $0xc8] sm:$0xff]  ;;  %p4875_p4 = por %p4874_p3, %p4873_p2 }
  0x2b   :  { %3658 = vmatpush3.msra.mxu0 %v75_v2  ;;  %3699 = vmatprep.subr.mxu1 %v211_v7  ;;  %v68_v16 = vld [vmem:[#allocation7 + $0x30] sm:$0xff]  ;;  %v67_v18 = vld [vmem:[#allocation7 + $0x28] sm:$0xff]  ;;  %v205_v19 = vld [vmem:[#allocation7 + $0xc0] sm:$0xff] }
  0x2c   :  { %3659 = vmatprep.subr.mxu0 %v74_v3  ;;  %3700 = vmatpush3.msra.mxu1 %v211_v7  ;;  %v66_v20 = vld [vmem:[#allocation7 + $0x20] sm:$0xff]  ;;  %v204_v21 = vld [vmem:[#allocation7 + $0xb8] sm:$0xff]  ;;  %v203_v23 = vld [vmem:[#allocation7 + $0xb0] sm:$0xff]  ;;  %p4876_p5 = pnand %p4875_p4, %p4869_p1 }
  0x2d   :  { %3660 = vmatpush3.msra.mxu0 %v74_v3  ;;  %3701 = vmatprep.subr.mxu1 %v210_v9  ;;  %v65_v22 = vld [vmem:[#allocation7 + $0x18] sm:$0xff]  ;;  %v64_v24 = vld [vmem:[#allocation7 + $0x10] sm:$0xff]  ;;  %v202_v25 = vld [vmem:[#allocation7 + $0xa8] sm:$0xff] }
  0x2e   :  { %3661 = vmatprep.subr.mxu0 %v73_v5  ;;  %3702 = vmatpush3.msra.mxu1 %v210_v9  ;;  %v63_v26 = vld [vmem:[#allocation7 + $0x8] sm:$0xff]  ;;  %v201_v27 = vld [vmem:[#allocation7 + $0xa0] sm:$0xff]  ;;  %v200_v30 = vld [vmem:[#allocation7 + $0x98] sm:$0xff] }
  0x2f   :  { %3662 = vmatpush3.msra.mxu0 %v73_v5  ;;  %3703 = vmatprep.subr.mxu1 %v209_v11  ;;  %v62_v28 = vld [vmem:[#allocation7] sm:$0xff]  ;;  %v55_v29 = vld [vmem:[#allocation4 + $0x8] sm:$0xff]  ;;  %v199_v31 = vld [vmem:[#allocation7 + $0x90] sm:$0xff] }
  0x30   :  { %3663 = vmatprep.subr.mxu0 %v72_v8  ;;  %3704 = vmatpush3.msra.mxu1 %v209_v11  ;;  %v198_v32 = vld [vmem:[#allocation7 + $0x88] sm:$0xff]  ;;  %v56_v33 = vld [vmem:[#allocation4 + $0x10] sm:$0xff]  ;;  %v197_v34 = vld [vmem:[#allocation7 + $0x80] sm:$0xff] }
  0x31   :  { %3664 = vmatpush3.msra.mxu0 %v72_v8  ;;  %3705 = vmatprep.subr.mxu1 %v208_v13  ;;  %v57_v35 = vld [vmem:[#allocation4 + $0x18] sm:$0xff]  ;;  %v58_v36 = vld [vmem:[#allocation4 + $0x20] sm:$0xff]  ;;  %v59_v37 = vld [vmem:[#allocation4 + $0x28] sm:$0xff] }
  0x32   :  { %3665 = vmatprep.subr.mxu0 %v71_v10  ;;  %3706 = vmatpush3.msra.mxu1 %v208_v13  ;;  %v60_v38 = vld [vmem:[#allocation4 + $0x30] sm:$0xff]  ;;  %v347_v39 = vld [vmem:[#allocation7 + $0x178] sm:$0xff]  ;;  %v345_v42 = vld [vmem:[#allocation7 + $0x168] sm:$0xff] }
  0x33   :  { %3666 = vmatpush3.msra.mxu0 %v71_v10  ;;  %3707 = vmatprep.subr.mxu1 %v207_v15  ;;  %v346_v40 = vld [vmem:[#allocation7 + $0x170] sm:$0xff]  ;;  %v61_v41 = vld [vmem:[#allocation4 + $0x38] sm:$0xff]  ;;  %v344_v43 = vld [vmem:[#allocation7 + $0x160] sm:$0xff] }
  0x34   :  { %3667 = vmatprep.subr.mxu0 %v70_v12  ;;  %3708 = vmatpush3.msra.mxu1 %v207_v15  ;;  %v343_v44 = vld [vmem:[#allocation7 + $0x158] sm:$0xff]  ;;  %v342_v45 = vld [vmem:[#allocation7 + $0x150] sm:$0xff]  ;;  %v341_v46 = vld [vmem:[#allocation7 + $0x148] sm:$0xff] }
  0x35   :  { %3668 = vmatpush3.msra.mxu0 %v70_v12  ;;  %3709 = vmatprep.subr.mxu1 %v206_v17  ;;  %v340_v47 = vld [vmem:[#allocation7 + $0x140] sm:$0xff]  ;;  %v339_v48 = vld [vmem:[#allocation7 + $0x138] sm:$0xff]  ;;  %v338_v49 = vld [vmem:[#allocation7 + $0x130] sm:$0xff] }
  0x36   :  { %3669 = vmatprep.subr.mxu0 %v69_v14  ;;  %3710 = vmatpush3.msra.mxu1 %v206_v17  ;;  %v337_v50 = vld [vmem:[#allocation7 + $0x128] sm:$0xff]  ;;  %v336_v51 = vld [vmem:[#allocation7 + $0x120] sm:$0xff]  ;;  %v335_v61 = vld [vmem:[#allocation7 + $0x118] sm:$0xff] }
  0x37   :  { %3670 = vmatpush3.msra.mxu0 %v69_v14  ;;  %3711 = vmatprep.subr.mxu1 %v205_v19  ;;  %v3086_v52 = vld [vmem:[#allocation9] ss:$0 sm:$0xff]  ;;  %v334_v63 = vld [vmem:[#allocation7 + $0x110] sm:$0xff]  ;;  %v333_v3 = vld [vmem:[#allocation7 + $0x108] sm:$0xff] }
  0x38   :  { %3671 = vmatprep.subr.mxu0 %v68_v16  ;;  %3712 = vmatpush3.msra.mxu1 %v205_v19  ;;  %v332_v7 = vld [vmem:[#allocation7 + $0x100] sm:$0xff]  ;;  %v482_v13 = vld [vmem:[#allocation7 + $0x1f8] sm:$0xff]  ;;  %v481_v14 = vld [vmem:[#allocation7 + $0x1f0] sm:$0xff] }
  0x39   :  { %3672 = vmatpush3.msra.mxu0 %v68_v16  ;;  %3713 = vmatprep.subr.mxu1 %v204_v21  ;;  %v480_v17 = vld [vmem:[#allocation7 + $0x1e8] sm:$0xff] }
  0x3a   :  { %3673 = vmatprep.subr.mxu0 %v67_v18  ;;  %3714 = vmatpush3.msra.mxu1 %v204_v21  ;;  %v478_v21 = vld [vmem:[#allocation7 + $0x1d8] sm:$0xff] }
  0x3b   :  { %3674 = vmatpush3.msra.mxu0 %v67_v18  ;;  %3715 = vmatprep.subr.mxu1 %v203_v23 }
  0x3c   :  { %3675 = vmatprep.subr.mxu0 %v66_v20  ;;  %3716 = vmatpush3.msra.mxu1 %v203_v23  ;;  %v476_v23 = vld [vmem:[#allocation7 + $0x1c8] sm:$0xff] }
  0x3d   :  { %3676 = vmatpush3.msra.mxu0 %v66_v20  ;;  %3717 = vmatprep.subr.mxu1 %v202_v25  ;;  %v479_v20 = vld [vmem:[#allocation7 + $0x1e0] sm:$0xff] }
  0x3e   :  { %3677 = vmatprep.subr.mxu0 %v65_v22  ;;  %3718 = vmatpush3.msra.mxu1 %v202_v25  ;;  %v474_v25 = vld [vmem:[#allocation7 + $0x1b8] sm:$0xff] }
  0x3f   :  { %3678 = vmatpush3.msra.mxu0 %v65_v22  ;;  %3719 = vmatprep.subr.mxu1 %v201_v27  ;;  %v477_v22 = vld [vmem:[#allocation7 + $0x1d0] sm:$0xff] }
  0x40   :  { %3679 = vmatprep.subr.mxu0 %v64_v24  ;;  %3720 = vmatpush3.msra.mxu1 %v201_v27  ;;  %v472_v27 = vld [vmem:[#allocation7 + $0x1a8] sm:$0xff] }
  0x41   :  { %3680 = vmatpush3.msra.mxu0 %v64_v24  ;;  %3721 = vmatprep.subr.mxu1 %v200_v30  ;;  %v475_v24 = vld [vmem:[#allocation7 + $0x1c0] sm:$0xff] }
  0x42   :  { %3681 = vmatprep.subr.mxu0 %v63_v26  ;;  %3722 = vmatpush3.msra.mxu1 %v200_v30 }
  0x43   :  { %3682 = vmatpush3.msra.mxu0 %v63_v26  ;;  %3723 = vmatprep.subr.mxu1 %v199_v31  ;;  %v473_v26 = vld [vmem:[#allocation7 + $0x1b0] sm:$0xff] }
  0x44   :  { %3683 = vmatprep.subr.mxu0 %v62_v28  ;;  %3724 = vmatpush3.msra.mxu1 %v199_v31 }
  0x45   :  { %3684 = vmatpush3.msra.mxu0 %v62_v28  ;;  %3725 = vmatprep.subr.mxu1 %v198_v32  ;;  %v471_v28 = vld [vmem:[#allocation7 + $0x1a0] sm:$0xff] }
  0x46   :  { %3686 = vmatmul.mubr.f32.vlgmr.msra.gmra.mxu0 %v55_v29  ;;  %3726 = vmatpush3.msra.mxu1 %v198_v32  ;;  %v3087_v29 = vld [vmem:[#allocation9 + $0x1] ss:$0 sm:$0xff] }
  0x47   :  { %3688 = vmatprep.mubr.f32.mxu0 %v56_v33  ;;  %3727 = vmatprep.subr.mxu1 %v197_v34 }
  0x48   :  { %3728 = vmatpush3.msra.mxu1 %v197_v34  ;;  %3741 = vmatprep.subr.mxu0 %v347_v39 }
  0x49   :  { %3742 = vmatpush3.msra.mxu0 %v347_v39  ;;  %3785 = vmatprep.subr.mxu1 %v482_v13 }
  0x4a   :  { %3689 = vmatmul.mubr.f32.gmra.mxu0 %v57_v35  ;;  %3743 = vmatprep.subr.mxu0 %v346_v40 }
  0x4b   :  { %3691 = vmatprep.mubr.f32.mxu0 %v58_v36  ;;  %3744 = vmatpush3.msra.mxu0 %v346_v40  ;;  %v469_v40 = vld [vmem:[#allocation7 + $0x190] sm:$0xff] }
  0x4c   :  { %3745 = vmatprep.subr.mxu0 %v345_v42 }
  0x4d   :  { %3746 = vmatpush3.msra.mxu0 %v345_v42 }
  0x4e   :  { %3692 = vmatmul.mubr.f32.gmra.mxu0 %v59_v37  ;;  %3747 = vmatprep.subr.mxu0 %v344_v43  ;;  %v470_v37 = vld [vmem:[#allocation7 + $0x198] sm:$0xff] }
  0x4f   :  { %3694 = vmatprep.mubr.f32.mxu0 %v60_v38  ;;  %3748 = vmatpush3.msra.mxu0 %v344_v43 }
  0x50   :  { %3749 = vmatprep.subr.mxu0 %v343_v44 }
  0x51   :  { %3750 = vmatpush3.msra.mxu0 %v343_v44  ;;  %v468_v44 = vld [vmem:[#allocation7 + $0x188] sm:$0xff] }
  0x52   :  { %3695 = vmatmul.mubr.f32.gmra.mxu0 %v61_v41  ;;  %3751 = vmatprep.subr.mxu0 %v342_v45 }
  0x53   :  { %3752 = vmatpush3.msra.mxu0 %v342_v45 }
  0x54   :  { %3753 = vmatprep.subr.mxu0 %v341_v46 }
  0x55   :  { %3754 = vmatpush3.msra.mxu0 %v341_v46 }
  0x56   :  { %3755 = vmatprep.subr.mxu0 %v340_v47 }
  0x57   :  { %3756 = vmatpush3.msra.mxu0 %v340_v47 }
  0x58   :  { %3757 = vmatprep.subr.mxu0 %v339_v48 }
  0x59   :  { %3758 = vmatpush3.msra.mxu0 %v339_v48  ;;  %v467_v48 = vld [vmem:[#allocation7 + $0x180] sm:$0xff] }
  0x5a   :  { %3759 = vmatprep.subr.mxu0 %v338_v49 }
  0x5b   :  { %3760 = vmatpush3.msra.mxu0 %v338_v49 }
  0x5c   :  { %3761 = vmatprep.subr.mxu0 %v337_v50 }
  0x5d   :  { %3762 = vmatpush3.msra.mxu0 %v337_v50 }
  0x5e   :  { %3763 = vmatprep.subr.mxu0 %v336_v51 }
  0x5f   :  { %3764 = vmatpush3.msra.mxu0 %v336_v51 }
  0x60   :  { %3765 = vmatprep.subr.mxu0 %v335_v61 }
  0x61   :  { %3766 = vmatpush3.msra.mxu0 %v335_v61 }
  0x62   :  { %3767 = vmatprep.subr.mxu0 %v334_v63 }
  0x63   :  { %3768 = vmatpush3.msra.mxu0 %v334_v63  ;;  %v4953_v63 = vld [vmem:[#allocation7 + $0x258] sm:$0xff] }
  0x64   :  { %3769 = vmatprep.subr.mxu0 %v333_v3 }
  0x65   :  { %3770 = vmatpush3.msra.mxu0 %v333_v3 }
  0x66   :  { %3771 = vmatprep.subr.mxu0 %v332_v7 }
  0x67   :  { %3772 = vmatpush3.msra.mxu0 %v332_v7 }
 0x106   :  { %v3687_v53 = vpop.f32.mrf.mxu0 }
 0x107   :  { %v155_v54 = vadd.f32 %v3687_v53, %v3086_v52 }
 0x108   :  { %v149_v55 = vpop.f32.mrf.mxu0 }
 0x109   :  { %v150_v56 = vadd.f32 %v3086_v52, %v149_v55  ;;  %v189_v58 = vmax.f32 %v155_v54, 0.0  ;;  %v4937_v54 = vld [vmem:[#allocation7 + $0x278] sm:$0xff] }
 0x10a   :  { %v3690_v59 = vpop.f32.mrf.mxu0 }
 0x10b   :  { %v188_v57 = vmax.f32 %v150_v56, 0.0  ;;  %v165_v60 = vadd.f32 %v3690_v59, %v3086_v52  ;;  %v4899_v56 = vmov 0.0  }
 0x10c   :  { %v159_v62 = vpop.f32.mrf.mxu0  ;;  %3829 = vmatprep.subr.mxu0 %v4899_v56 }
 0x10d   :  { %3729 = vmatprep.mubr.f32.mxu1 %v188_v57  ;;  %v160_v0 = vadd.f32 %v3086_v52, %v159_v62  ;;  %v191_v1 = vmax.f32 %v165_v60, 0.0  ;;  %v4941_v57 = vld [vmem:[#allocation7 + $0x270] sm:$0xff]  ;;  %v4945_v60 = vld [vmem:[#allocation7 + $0x268] sm:$0xff]  ;;  %v4949_v62 = vld [vmem:[#allocation7 + $0x260] sm:$0xff] }
 0x10e   :  { %3730 = vmatmul.mubr.f32.vlgmr.msra.gmra.mxu1 %v189_v58  ;;  %v3693_v2 = vpop.f32.mrf.mxu0 }
 0x10f   :  { %v190_v4 = vmax.f32 %v160_v0, 0.0  ;;  %v175_v5 = vadd.f32 %v3693_v2, %v3086_v52  ;;  %3786 = vmatpush3.msra.mxu1 %v482_v13  ;;  %v4957_v0 = vld [vmem:[#allocation7 + $0x250] sm:$0xff]  ;;  %v4967_v2 = vld [vmem:[#allocation9 + $0x2] ss:$0 sm:$0xff]  ;;  %v4985_v13 = vld [vmem:[#allocation7 + $0x2d8] sm:$0xff] }
 0x110   :  { %v169_v6 = vpop.f32.mrf.mxu0  ;;  %3787 = vmatprep.subr.mxu1 %v481_v14 }
 0x111   :  { %v170_v8 = vadd.f32 %v3086_v52, %v169_v6  ;;  %3732 = vmatprep.mubr.f32.mxu1 %v190_v4  ;;  %v193_v9 = vmax.f32 %v175_v5, 0.0  ;;  %3788 = vmatpush3.msra.mxu1 %v481_v14  ;;  %v4989_v14 = vld [vmem:[#allocation7 + $0x2d0] sm:$0xff] }
 0x112   :  { %v3696_v10 = vpop.f32.mrf.mxu0  ;;  %3733 = vmatmul.mubr.f32.gmra.mxu1 %v191_v1  ;;  %3789 = vmatprep.subr.mxu1 %v480_v17  ;;  %v4963_v1 = vld [vmem:[#allocation7 + $0x248] sm:$0xff] }
 0x113   :  { %v192_v11 = vmax.f32 %v170_v8, 0.0  ;;  %v185_v12 = vadd.f32 %v3696_v10, %v3086_v52  ;;  %3790 = vmatpush3.msra.mxu1 %v480_v17  ;;  %v4973_v10 = vld [vmem:[#allocation7 + $0x2f0] sm:$0xff] }
 0x114   :  { %v179_v15 = vpop.f32.mrf.mxu0  ;;  %3791 = vmatprep.subr.mxu1 %v479_v20 }
 0x115   :  { %v180_v16 = vadd.f32 %v3086_v52, %v179_v15  ;;  %3735 = vmatprep.mubr.f32.mxu1 %v192_v11  ;;  %v195_v18 = vmax.f32 %v185_v12, 0.0  ;;  %3792 = vmatpush3.msra.mxu1 %v479_v20  ;;  %v4977_v11 = vld [vmem:[#allocation7 + $0x2e8] sm:$0xff]  ;;  %v4981_v12 = vld [vmem:[#allocation7 + $0x2e0] sm:$0xff] }
 0x116   :  { %3736 = vmatmul.mubr.f32.gmra.mxu1 %v193_v9  ;;  %3793 = vmatprep.subr.mxu1 %v478_v21  ;;  %v4971_v9 = vld [vmem:[#allocation7 + $0x2f8] sm:$0xff]  ;;  %v5003_v20 = vld [vmem:[#allocation7 + $0x2c0] sm:$0xff] }
 0x117   :  { %v194_v19 = vmax.f32 %v180_v16, 0.0  ;;  %3794 = vmatpush3.msra.mxu1 %v478_v21  ;;  %v4995_v16 = vld [vmem:[#allocation7 + $0x2c8] sm:$0xff] }
 0x118   :  { %3795 = vmatprep.subr.mxu1 %v477_v22 }
 0x119   :  { %3738 = vmatprep.mubr.f32.mxu1 %v194_v19  ;;  %3796 = vmatpush3.msra.mxu1 %v477_v22  ;;  %v5008_v22 = vld [vmem:[#allocation7 + $0x238] sm:$0xff] }
 0x11a   :  { %3739 = vmatmul.mubr.f32.gmra.mxu1 %v195_v18  ;;  %3797 = vmatprep.subr.mxu1 %v476_v23  ;;  %v4999_v18 = vld [vmem:[#allocation7 + $0x240] sm:$0xff] }
 0x11b   :  { %3798 = vmatpush3.msra.mxu1 %v476_v23 }
 0x11c   :  { %3799 = vmatprep.subr.mxu1 %v475_v24 }
 0x11d   :  { %3800 = vmatpush3.msra.mxu1 %v475_v24  ;;  %v5012_v24 = vld [vmem:[#allocation7 + $0x2b8] sm:$0xff] }
 0x11e   :  { %3801 = vmatprep.subr.mxu1 %v474_v25 }
 0x11f   :  { %3802 = vmatpush3.msra.mxu1 %v474_v25 }
 0x120   :  { %3803 = vmatprep.subr.mxu1 %v473_v26 }
 0x121   :  { %3804 = vmatpush3.msra.mxu1 %v473_v26 }
 0x122   :  { %3805 = vmatprep.subr.mxu1 %v472_v27 }
 0x123   :  { %3806 = vmatpush3.msra.mxu1 %v472_v27  ;;  %v5016_v27 = vld [vmem:[#allocation7 + $0x230] sm:$0xff] }
 0x124   :  { %3807 = vmatprep.subr.mxu1 %v471_v28 }
 0x125   :  { %3808 = vmatpush3.msra.mxu1 %v471_v28 }
 0x126   :  { %3809 = vmatprep.subr.mxu1 %v470_v37 }
 0x127   :  { %3810 = vmatpush3.msra.mxu1 %v470_v37 }
 0x128   :  { %3811 = vmatprep.subr.mxu1 %v469_v40 }
 0x129   :  { %3812 = vmatpush3.msra.mxu1 %v469_v40  ;;  %v5038_v40 = vld [vmem:[#allocation7 + $0x218] sm:$0xff] }
 0x12a   :  { %3813 = vmatprep.subr.mxu1 %v468_v44 }
 0x12b   :  { %3814 = vmatpush3.msra.mxu1 %v468_v44 }
 0x12c   :  { %3815 = vmatprep.subr.mxu1 %v467_v48 }
 0x12d   :  { %3816 = vmatpush3.msra.mxu1 %v467_v48  ;;  %v5056_v48 = vld [vmem:[#allocation7 + $0x208] sm:$0xff] }
 0x12e   :  { %3864 = vmatprep.subr.mxu1 %v4899_v56 }
 0x1ce   :  { %v3731_v30 = vpop.f32.mrf.mxu1 }
 0x1cf   :  { %v290_v31 = vadd.f32 %v3731_v30, %v3087_v29  ;;  %v5021_v30 = vld [vmem:[#allocation7 + $0x2b0] sm:$0xff] }
 0x1d0   :  { %v284_v32 = vpop.f32.mrf.mxu1 }
 0x1d1   :  { %v285_v33 = vadd.f32 %v3087_v29, %v284_v32  ;;  %v324_v35 = vmax.f32 %v290_v31, 0.0  ;;  %v5023_v31 = vld [vmem:[#allocation7 + $0x228] sm:$0xff] }
 0x1d2   :  { %v3734_v36 = vpop.f32.mrf.mxu1 }
 0x1d3   :  { %v323_v34 = vmax.f32 %v285_v33, 0.0  ;;  %v300_v38 = vadd.f32 %v3734_v36, %v3087_v29  ;;  %v5027_v33 = vld [vmem:[#allocation7 + $0x2a8] sm:$0xff] }
 0x1d4   :  { %v294_v39 = vpop.f32.mrf.mxu1 }
 0x1d5   :  { %3773 = vmatprep.mubr.f32.mxu0 %v323_v34  ;;  %v295_v41 = vadd.f32 %v3087_v29, %v294_v39  ;;  %v326_v42 = vmax.f32 %v300_v38, 0.0  ;;  %v5036_v39 = vld [vmem:[#allocation7 + $0x2a0] sm:$0xff] }
 0x1d6   :  { %3774 = vmatmul.mubr.f32.vlgmr.msra.gmra.mxu0 %v324_v35  ;;  %v3737_v43 = vpop.f32.mrf.mxu1  ;;  %v5031_v35 = vld [vmem:[#allocation7 + $0x220] sm:$0xff] }
 0x1d7   :  { %v325_v45 = vmax.f32 %v295_v41, 0.0  ;;  %v310_v46 = vadd.f32 %v3737_v43, %v3087_v29  ;;  %3830 = vmatpush3.msra.mxu0 %v4937_v54  ;;  %v5045_v43 = vld [vmem:[#allocation7 + $0x298] sm:$0xff] }
 0x1d8   :  { %v304_v47 = vpop.f32.mrf.mxu1  ;;  %3831 = vmatprep.subr.mxu0 %v4899_v56 }
 0x1d9   :  { %v305_v49 = vadd.f32 %v3087_v29, %v304_v47  ;;  %3776 = vmatprep.mubr.f32.mxu0 %v325_v45  ;;  %v328_v50 = vmax.f32 %v310_v46, 0.0  ;;  %3832 = vmatpush3.msra.mxu0 %v4941_v57  ;;  %v5049_v45 = vld [vmem:[#allocation7 + $0x210] sm:$0xff] }
 0x1da   :  { %v3740_v51 = vpop.f32.mrf.mxu1  ;;  %3777 = vmatmul.mubr.f32.gmra.mxu0 %v326_v42  ;;  %3833 = vmatprep.subr.mxu0 %v4899_v56  ;;  %v5054_v47 = vld [vmem:[#allocation7 + $0x290] sm:$0xff] }
 0x1db   :  { %v327_v52 = vmax.f32 %v305_v49, 0.0  ;;  %v320_v53 = vadd.f32 %v3740_v51, %v3087_v29  ;;  %3834 = vmatpush3.msra.mxu0 %v4945_v60  ;;  %v5061_v49 = vld [vmem:[#allocation7 + $0x288] sm:$0xff]  ;;  %v5068_v51 = vld [vmem:[#allocation7 + $0x280] sm:$0xff] }
 0x1dc   :  { %v314_v55 = vpop.f32.mrf.mxu1  ;;  %3835 = vmatprep.subr.mxu0 %v4899_v56 }
 0x1dd   :  { %v315_v58 = vadd.f32 %v3087_v29, %v314_v55  ;;  %3779 = vmatprep.mubr.f32.mxu0 %v327_v52  ;;  %v330_v59 = vmax.f32 %v320_v53, 0.0  ;;  %3836 = vmatpush3.msra.mxu0 %v4949_v62  ;;  %v5083_v53 = vld [vmem:[#allocation9 + $0x3] ss:$0 sm:$0xff] }
 0x1de   :  { %3780 = vmatmul.mubr.f32.gmra.mxu0 %v328_v50  ;;  %3837 = vmatprep.subr.mxu0 %v4899_v56  ;;  %v5065_v50 = vld [vmem:[#allocation7 + $0x200] sm:$0xff] }
 0x1df   :  { %v329_v61 = vmax.f32 %v315_v58, 0.0  ;;  %3838 = vmatpush3.msra.mxu0 %v4953_v63 }
 0x1e0   :  { %3839 = vmatprep.subr.mxu0 %v4899_v56 }
 0x1e1   :  { %3782 = vmatprep.mubr.f32.mxu0 %v329_v61  ;;  %3840 = vmatpush3.msra.mxu0 %v4957_v0 }
 0x1e2   :  { %3783 = vmatmul.mubr.f32.gmra.mxu0 %v330_v59  ;;  %3841 = vmatprep.subr.mxu0 %v4899_v56  ;;  %v5086_v59 = vld [vmem:[#allocation7 + $0x378] sm:$0xff] }
 0x1e3   :  { %3842 = vmatpush3.msra.mxu0 %v4963_v1  ;;  %3861 = vmatprep.mubr.msk.f32.mxu0 %vm4900_vm0, %v4899_v56 }
 0x1e4   :  { %3843 = vmatprep.subr.mxu0 %v4899_v56 }
 0x1e5   :  { %3844 = vmatpush3.msra.mxu0 %v4999_v18 }
 0x1e6   :  { %3845 = vmatprep.subr.mxu0 %v4899_v56 }
 0x1e7   :  { %3846 = vmatpush3.msra.mxu0 %v5008_v22 }
 0x1e8   :  { %3847 = vmatprep.subr.mxu0 %v4899_v56 }
 0x1e9   :  { %3848 = vmatpush3.msra.mxu0 %v5016_v27 }
 0x1ea   :  { %3849 = vmatprep.subr.mxu0 %v4899_v56 }
 0x1eb   :  { %3850 = vmatpush3.msra.mxu0 %v5023_v31 }
 0x1ec   :  { %3851 = vmatprep.subr.mxu0 %v4899_v56 }
 0x1ed   :  { %3852 = vmatpush3.msra.mxu0 %v5031_v35 }
 0x1ee   :  { %3853 = vmatprep.subr.mxu0 %v4899_v56 }
 0x1ef   :  { %3854 = vmatpush3.msra.mxu0 %v5038_v40 }
 0x1f0   :  { %3855 = vmatprep.subr.mxu0 %v4899_v56 }
 0x1f1   :  { %3856 = vmatpush3.msra.mxu0 %v5049_v45 }
 0x1f2   :  { %3857 = vmatprep.subr.mxu0 %v4899_v56 }
 0x1f3   :  { %3858 = vmatpush3.msra.mxu0 %v5056_v48 }
 0x1f4   :  { %3859 = vmatprep.subr.mxu0 %v4899_v56 }
 0x1f5   :  { %3860 = vmatpush3.msra.mxu0 %v5065_v50 }
 0x1f6   :  { %3899 = vmatprep.subr.mxu0 %v4899_v56 }
 0x296   :  { %v3775_v3 = vpop.f32.mrf.mxu0 }
 0x297   :  { %v425_v4 = vadd.f32 %v3775_v3, %v4967_v2  ;;  %v5094_v3 = vld [vmem:[#allocation7 + $0x368] sm:$0xff] }
 0x298   :  { %v419_v5 = vpop.f32.mrf.mxu0 }
 0x299   :  { %v420_v6 = vadd.f32 %v4967_v2, %v419_v5  ;;  %v459_v8 = vmax.f32 %v425_v4, 0.0  ;;  %v5100_v4 = vld [vmem:[#allocation7 + $0x360] sm:$0xff]  ;;  %v5106_v5 = vld [vmem:[#allocation7 + $0x358] sm:$0xff] }
 0x29a   :  { %v3778_v15 = vpop.f32.mrf.mxu0 }
 0x29b   :  { %v458_v7 = vmax.f32 %v420_v6, 0.0  ;;  %v435_v17 = vadd.f32 %v3778_v15, %v4967_v2  ;;  %v5112_v6 = vld [vmem:[#allocation7 + $0x350] sm:$0xff]  ;;  %v5130_v15 = vld [vmem:[#allocation7 + $0x338] sm:$0xff] }
 0x29c   :  { %v429_v19 = vpop.f32.mrf.mxu0 }
 0x29d   :  { %3817 = vmatprep.mubr.f32.mxu1 %v458_v7  ;;  %v430_v21 = vadd.f32 %v4967_v2, %v429_v19  ;;  %v461_v25 = vmax.f32 %v435_v17, 0.0  ;;  %v5118_v7 = vld [vmem:[#allocation7 + $0x348] sm:$0xff]  ;;  %v5136_v17 = vld [vmem:[#allocation7 + $0x330] sm:$0xff] }
 0x29e   :  { %3818 = vmatmul.mubr.f32.vlgmr.msra.gmra.mxu1 %v459_v8  ;;  %v3781_v23 = vpop.f32.mrf.mxu0  ;;  %v5124_v8 = vld [vmem:[#allocation7 + $0x340] sm:$0xff]  ;;  %v5142_v19 = vld [vmem:[#allocation7 + $0x328] sm:$0xff] }
 0x29f   :  { %3865 = vmatpush3.msra.mxu1 %v4971_v9  ;;  %v460_v26 = vmax.f32 %v430_v21, 0.0  ;;  %v445_v28 = vadd.f32 %v3781_v23, %v4967_v2  ;;  %v5148_v21 = vld [vmem:[#allocation7 + $0x320] sm:$0xff]  ;;  %v5154_v23 = vld [vmem:[#allocation7 + $0x318] sm:$0xff] }
 0x2a0   :  { %3866 = vmatprep.subr.mxu1 %v4899_v56  ;;  %v439_v29 = vpop.f32.mrf.mxu0 }
 0x2a1   :  { %3867 = vmatpush3.msra.mxu1 %v4973_v10  ;;  %v440_v32 = vadd.f32 %v4967_v2, %v439_v29  ;;  %3820 = vmatprep.mubr.f32.mxu1 %v460_v26  ;;  %v463_v37 = vmax.f32 %v445_v28, 0.0  ;;  %v5166_v26 = vld [vmem:[#allocation7 + $0x308] sm:$0xff]  ;;  %v5172_v28 = vld [vmem:[#allocation7 + $0x300] sm:$0xff] }
 0x2a2   :  { %3868 = vmatprep.subr.mxu1 %v4899_v56  ;;  %v3784_v34 = vpop.f32.mrf.mxu0  ;;  %3821 = vmatmul.mubr.f32.gmra.mxu1 %v461_v25  ;;  %v5160_v25 = vld [vmem:[#allocation7 + $0x310] sm:$0xff] }
 0x2a3   :  { %3869 = vmatpush3.msra.mxu1 %v4977_v11  ;;  %v462_v36 = vmax.f32 %v440_v32, 0.0  ;;  %v455_v41 = vadd.f32 %v3784_v34, %v4967_v2 }
 0x2a4   :  { %3870 = vmatprep.subr.mxu1 %v4899_v56  ;;  %v449_v38 = vpop.f32.mrf.mxu0 }
 0x2a5   :  { %3871 = vmatpush3.msra.mxu1 %v4981_v12  ;;  %v450_v42 = vadd.f32 %v4967_v2, %v449_v38  ;;  %3823 = vmatprep.mubr.f32.mxu1 %v462_v36  ;;  %v465_v46 = vmax.f32 %v455_v41, 0.0  ;;  %v5088_v2 = vld [vmem:[#allocation7 + $0x370] sm:$0xff] }
 0x2a6   :  { %3872 = vmatprep.subr.mxu1 %v4899_v56  ;;  %3824 = vmatmul.mubr.f32.gmra.mxu1 %v463_v37 }
 0x2a7   :  { %3873 = vmatpush3.msra.mxu1 %v4985_v13  ;;  %v464_v44 = vmax.f32 %v450_v42, 0.0 }
 0x2a8   :  { %3874 = vmatprep.subr.mxu1 %v4899_v56 }
 0x2a9   :  { %3875 = vmatpush3.msra.mxu1 %v4989_v14  ;;  %3826 = vmatprep.mubr.f32.mxu1 %v464_v44 }
 0x2aa   :  { %3876 = vmatprep.subr.mxu1 %v4899_v56  ;;  %3827 = vmatmul.mubr.f32.gmra.mxu1 %v465_v46 }
 0x2ab   :  { %3877 = vmatpush3.msra.mxu1 %v4995_v16  ;;  %3896 = vmatprep.mubr.msk.f32.mxu1 %vm4900_vm0, %v4899_v56 }
 0x2ac   :  { %3878 = vmatprep.subr.mxu1 %v4899_v56 }
 0x2ad   :  { %3879 = vmatpush3.msra.mxu1 %v5003_v20 }
 0x2ae   :  { %3880 = vmatprep.subr.mxu1 %v4899_v56 }
 0x2af   :  { %3881 = vmatpush3.msra.mxu1 %v5012_v24 }
 0x2b0   :  { %3882 = vmatprep.subr.mxu1 %v4899_v56 }
 0x2b1   :  { %3883 = vmatpush3.msra.mxu1 %v5021_v30 }
 0x2b2   :  { %3884 = vmatprep.subr.mxu1 %v4899_v56 }
 0x2b3   :  { %3885 = vmatpush3.msra.mxu1 %v5027_v33 }
 0x2b4   :  { %3886 = vmatprep.subr.mxu1 %v4899_v56 }
 0x2b5   :  { %3887 = vmatpush3.msra.mxu1 %v5036_v39 }
 0x2b6   :  { %3888 = vmatprep.subr.mxu1 %v4899_v56 }
 0x2b7   :  { %3889 = vmatpush3.msra.mxu1 %v5045_v43 }
 0x2b8   :  { %3890 = vmatprep.subr.mxu1 %v4899_v56 }
 0x2b9   :  { %3891 = vmatpush3.msra.mxu1 %v5054_v47 }
 0x2ba   :  { %3892 = vmatprep.subr.mxu1 %v4899_v56 }
 0x2bb   :  { %3893 = vmatpush3.msra.mxu1 %v5061_v49 }
 0x2bc   :  { %3894 = vmatprep.subr.mxu1 %v4899_v56 }
 0x2bd   :  { %3895 = vmatpush3.msra.mxu1 %v5068_v51 }
 0x2be   :  { %3934 = vmatprep.subr.mxu1 %v4899_v56 }
 0x35e   :  { %v5081_v52 = vpop.f32.mrf.mxu1 }
 0x35f   :  { %v560_v41 = vadd.f32 %v5081_v52, %v5083_v53  ;;  %v5345_v52 = vld [vmem:[#allocation7 + $0x278] sm:$0xff] }
 0x360   :  { %v554_v55 = vpop.f32.mrf.mxu1 }
 0x361   :  { %v555_v58 = vadd.f32 %v5083_v53, %v554_v55 }
 0x362   :  { %v5221_v29 = vpop.f32.mrf.mxu1 }
 0x363   :  { %4774 = vtanh.f32 %v555_v58 }
 0x364   :  { %v5223_v32 = vpop.f32.mrf.mxu1 }
 0x366   :  { %v5225_v34 = vpop.f32.mrf.mxu1 }
 0x368   :  { %v5227_v36 = vpop.f32.mrf.mxu1 }
 0x36a   :  { %v5229_v37 = vpop.f32.mrf.mxu1 }
 0x36c   :  { %v5231_v38 = vpop.f32.mrf.mxu1 }
 0x370   :  { %v4775_v61 = vpop.eup %4774 }
 0x371   :  { %3862 = vmatmul.mubr.f32.vlgmr.msra.gmra.mxu0 %v4775_v61  ;;  %3897 = vmatmul.mubr.f32.vlgmr.msra.gmra.mxu1 %v4775_v61 }
 0x372   :  { %3900 = vmatpush3.msra.mxu0 %v5086_v59  ;;  %3931 = vmatprep.mubr.msk.f32.mxu0 %vm4900_vm0, %v4899_v56 }
 0x373   :  { %3901 = vmatprep.subr.mxu0 %v4899_v56  ;;  %3935 = vmatpush3.msra.mxu1 %v4937_v54 }
 0x374   :  { %3902 = vmatpush3.msra.mxu0 %v5088_v2  ;;  %3936 = vmatprep.subr.mxu1 %v4899_v56 }
 0x375   :  { %3903 = vmatprep.subr.mxu0 %v4899_v56  ;;  %3937 = vmatpush3.msra.mxu1 %v4941_v57 }
 0x376   :  { %3904 = vmatpush3.msra.mxu0 %v5094_v3  ;;  %3938 = vmatprep.subr.mxu1 %v4899_v56 }
 0x377   :  { %3905 = vmatprep.subr.mxu0 %v4899_v56  ;;  %3939 = vmatpush3.msra.mxu1 %v4945_v60 }
 0x378   :  { %3906 = vmatpush3.msra.mxu0 %v5100_v4  ;;  %3940 = vmatprep.subr.mxu1 %v4899_v56 }
 0x379   :  { %3907 = vmatprep.subr.mxu0 %v4899_v56  ;;  %3941 = vmatpush3.msra.mxu1 %v4949_v62 }
 0x37a   :  { %3908 = vmatpush3.msra.mxu0 %v5106_v5  ;;  %3942 = vmatprep.subr.mxu1 %v4899_v56 }
 0x37b   :  { %3909 = vmatprep.subr.mxu0 %v4899_v56  ;;  %3943 = vmatpush3.msra.mxu1 %v4953_v63 }
 0x37c   :  { %3910 = vmatpush3.msra.mxu0 %v5112_v6  ;;  %3944 = vmatprep.subr.mxu1 %v4899_v56 }
 0x37d   :  { %3911 = vmatprep.subr.mxu0 %v4899_v56  ;;  %3945 = vmatpush3.msra.mxu1 %v4957_v0 }
 0x37e   :  { %3912 = vmatpush3.msra.mxu0 %v5118_v7  ;;  %3946 = vmatprep.subr.mxu1 %v4899_v56 }
 0x37f   :  { %3913 = vmatprep.subr.mxu0 %v4899_v56  ;;  %3947 = vmatpush3.msra.mxu1 %v4963_v1 }
 0x380   :  { %3914 = vmatpush3.msra.mxu0 %v5124_v8  ;;  %3948 = vmatprep.subr.mxu1 %v4899_v56 }
 0x381   :  { %3915 = vmatprep.subr.mxu0 %v4899_v56  ;;  %3949 = vmatpush3.msra.mxu1 %v4999_v18 }
 0x382   :  { %3916 = vmatpush3.msra.mxu0 %v5130_v15  ;;  %3950 = vmatprep.subr.mxu1 %v4899_v56 }
 0x383   :  { %3917 = vmatprep.subr.mxu0 %v4899_v56  ;;  %3951 = vmatpush3.msra.mxu1 %v5008_v22 }
 0x384   :  { %3918 = vmatpush3.msra.mxu0 %v5136_v17  ;;  %3952 = vmatprep.subr.mxu1 %v4899_v56 }
 0x385   :  { %3919 = vmatprep.subr.mxu0 %v4899_v56  ;;  %3953 = vmatpush3.msra.mxu1 %v5016_v27 }
 0x386   :  { %3920 = vmatpush3.msra.mxu0 %v5142_v19  ;;  %3954 = vmatprep.subr.mxu1 %v4899_v56 }
 0x387   :  { %3921 = vmatprep.subr.mxu0 %v4899_v56  ;;  %3955 = vmatpush3.msra.mxu1 %v5023_v31 }
 0x388   :  { %3922 = vmatpush3.msra.mxu0 %v5148_v21  ;;  %3956 = vmatprep.subr.mxu1 %v4899_v56 }
 0x389   :  { %3923 = vmatprep.subr.mxu0 %v4899_v56  ;;  %3957 = vmatpush3.msra.mxu1 %v5031_v35 }
 0x38a   :  { %3924 = vmatpush3.msra.mxu0 %v5154_v23  ;;  %3958 = vmatprep.subr.mxu1 %v4899_v56 }
 0x38b   :  { %3925 = vmatprep.subr.mxu0 %v4899_v56  ;;  %3959 = vmatpush3.msra.mxu1 %v5038_v40 }
 0x38c   :  { %3926 = vmatpush3.msra.mxu0 %v5160_v25  ;;  %3960 = vmatprep.subr.mxu1 %v4899_v56 }
 0x38d   :  { %3927 = vmatprep.subr.mxu0 %v4899_v56  ;;  %3961 = vmatpush3.msra.mxu1 %v5049_v45 }
 0x38e   :  { %3928 = vmatpush3.msra.mxu0 %v5166_v26  ;;  %3962 = vmatprep.subr.mxu1 %v4899_v56 }
 0x38f   :  { %3929 = vmatprep.subr.mxu0 %v4899_v56  ;;  %3963 = vmatpush3.msra.mxu1 %v5056_v48 }
 0x390   :  { %3930 = vmatpush3.msra.mxu0 %v5172_v28  ;;  %3964 = vmatprep.subr.mxu1 %v4899_v56 }
 0x391   :  { %3932 = vmatmul.mubr.f32.vlgmr.msra.gmra.mxu0 %v4899_v56  ;;  %3969 = vmatprep.subr.mxu0 %v4899_v56 }
 0x392   :  { %3970 = vmatpush3.msra.mxu0 %v4971_v9  ;;  %3965 = vmatpush3.msra.mxu1 %v5065_v50 }
 0x393   :  { %3971 = vmatprep.subr.mxu0 %v4899_v56  ;;  %3966 = vmatprep.mubr.msk.f32.mxu1 %vm4900_vm0, %v4899_v56 }
 0x394   :  { %3972 = vmatpush3.msra.mxu0 %v4973_v10  ;;  %4001 = vmatprep.mubr.msk.f32.mxu0 %vm4900_vm0, %v4899_v56 }
 0x395   :  { %3973 = vmatprep.subr.mxu0 %v4899_v56  ;;  %4004 = vmatprep.subr.mxu1 %v4899_v56 }
 0x396   :  { %3974 = vmatpush3.msra.mxu0 %v4977_v11 }
 0x397   :  { %3975 = vmatprep.subr.mxu0 %v4899_v56 }
 0x398   :  { %3976 = vmatpush3.msra.mxu0 %v4981_v12 }
 0x399   :  { %3977 = vmatprep.subr.mxu0 %v4899_v56 }
 0x39a   :  { %3978 = vmatpush3.msra.mxu0 %v4985_v13 }
 0x39b   :  { %3979 = vmatprep.subr.mxu0 %v4899_v56 }
 0x39c   :  { %3980 = vmatpush3.msra.mxu0 %v4989_v14 }
 0x39d   :  { %3981 = vmatprep.subr.mxu0 %v4899_v56 }
 0x39e   :  { %3982 = vmatpush3.msra.mxu0 %v4995_v16 }
 0x39f   :  { %3983 = vmatprep.subr.mxu0 %v4899_v56 }
 0x3a0   :  { %3984 = vmatpush3.msra.mxu0 %v5003_v20 }
 0x3a1   :  { %3985 = vmatprep.subr.mxu0 %v4899_v56 }
 0x3a2   :  { %3986 = vmatpush3.msra.mxu0 %v5012_v24 }
 0x3a3   :  { %3987 = vmatprep.subr.mxu0 %v4899_v56 }
 0x3a4   :  { %3988 = vmatpush3.msra.mxu0 %v5021_v30 }
 0x3a5   :  { %3989 = vmatprep.subr.mxu0 %v4899_v56 }
 0x3a6   :  { %3990 = vmatpush3.msra.mxu0 %v5027_v33 }
 0x3a7   :  { %3991 = vmatprep.subr.mxu0 %v4899_v56 }
 0x3a8   :  { %3992 = vmatpush3.msra.mxu0 %v5036_v39 }
 0x3a9   :  { %3993 = vmatprep.subr.mxu0 %v4899_v56 }
 0x3aa   :  { %3994 = vmatpush3.msra.mxu0 %v5045_v43 }
 0x3ab   :  { %3995 = vmatprep.subr.mxu0 %v4899_v56 }
 0x3ac   :  { %3996 = vmatpush3.msra.mxu0 %v5054_v47 }
 0x3ad   :  { %3997 = vmatprep.subr.mxu0 %v4899_v56 }
 0x3ae   :  { %3998 = vmatpush3.msra.mxu0 %v5061_v49 }
 0x3af   :  { %3999 = vmatprep.subr.mxu0 %v4899_v56 }
 0x3b0   :  { %4000 = vmatpush3.msra.mxu0 %v5068_v51 }
 0x3b1   :  { %4039 = vmatprep.subr.mxu0 %v4899_v56 }
 0x431   :  { %v689_v42 = vpop.f32.mrf.mxu0  ;;  %v782_v44 = vpop.f32.mrf.mxu1 }
 0x432   :  { %v693_v46 = vadd.f32 %v689_v42, %v560_v41  ;;  %v5350_v41 = vld [vmem:[#allocation7 + $0x270] sm:$0xff]  ;;  %v5362_v42 = vld [vmem:[#allocation7 + $0x260] sm:$0xff] }
 0x433   :  { %v3863_v55 = vpop.f32.mrf.mxu0  ;;  %v3898_v58 = vpop.f32.mrf.mxu1 }
 0x434   :  { %4776 = vtanh.f32 %v693_v46  ;;  %v5374_v46 = vld [vmem:[#allocation7 + $0x250] sm:$0xff]  ;;  %v5380_v55 = vld [vmem:[#allocation7 + $0x248] sm:$0xff] }
 0x441   :  { %v4777_v61 = vpop.eup %4776 }
 0x442   :  { %3967 = vmatmul.mubr.f32.vlgmr.msra.gmra.mxu1 %v4777_v61  ;;  %4002 = vmatmul.mubr.f32.vlgmr.msra.gmra.mxu0 %v4777_v61 }
 0x443   :  { %4005 = vmatpush3.msra.mxu1 %v5086_v59  ;;  %4036 = vmatprep.mubr.msk.f32.mxu1 %vm4900_vm0, %v4899_v56 }
 0x444   :  { %4006 = vmatprep.subr.mxu1 %v4899_v56  ;;  %4040 = vmatpush3.msra.mxu0 %v4937_v54  ;;  %v5256_v54 = vld [vmem:[#allocation9 + $0x4] ss:$0 sm:$0xff] }
 0x445   :  { %4007 = vmatpush3.msra.mxu1 %v5088_v2  ;;  %4041 = vmatprep.subr.mxu0 %v4899_v56 }
 0x446   :  { %4008 = vmatprep.subr.mxu1 %v4899_v56  ;;  %4042 = vmatpush3.msra.mxu0 %v4941_v57  ;;  %v783_v57 = vadd.f32 %v5256_v54, %v782_v44  ;;  %v5368_v44 = vld [vmem:[#allocation7 + $0x258] sm:$0xff] }
 0x447   :  { %4009 = vmatpush3.msra.mxu1 %v5094_v3  ;;  %4043 = vmatprep.subr.mxu0 %v4899_v56 }
 0x448   :  { %4010 = vmatprep.subr.mxu1 %v4899_v56  ;;  %4044 = vmatpush3.msra.mxu0 %v4945_v60 }
 0x449   :  { %4011 = vmatpush3.msra.mxu1 %v5100_v4  ;;  %4045 = vmatprep.subr.mxu0 %v4899_v56 }
 0x44a   :  { %4012 = vmatprep.subr.mxu1 %v4899_v56  ;;  %4046 = vmatpush3.msra.mxu0 %v4949_v62 }
 0x44b   :  { %4013 = vmatpush3.msra.mxu1 %v5106_v5  ;;  %4047 = vmatprep.subr.mxu0 %v4899_v56 }
 0x44c   :  { %4014 = vmatprep.subr.mxu1 %v4899_v56  ;;  %4048 = vmatpush3.msra.mxu0 %v4953_v63 }
 0x44d   :  { %4015 = vmatpush3.msra.mxu1 %v5112_v6  ;;  %4049 = vmatprep.subr.mxu0 %v4899_v56 }
 0x44e   :  { %4016 = vmatprep.subr.mxu1 %v4899_v56  ;;  %4050 = vmatpush3.msra.mxu0 %v4957_v0 }
 0x44f   :  { %4017 = vmatpush3.msra.mxu1 %v5118_v7  ;;  %4051 = vmatprep.subr.mxu0 %v4899_v56 }
 0x450   :  { %4018 = vmatprep.subr.mxu1 %v4899_v56  ;;  %4052 = vmatpush3.msra.mxu0 %v4963_v1  ;;  %v565_v1 = vadd.f32 %v5083_v53, %v5223_v32  ;;  %v5356_v32 = vld [vmem:[#allocation7 + $0x268] sm:$0xff] }
 0x451   :  { %v869_v60 = vpop.f32.mrf.mxu0  ;;  %4019 = vmatpush3.msra.mxu1 %v5124_v8  ;;  %4053 = vmatprep.subr.mxu0 %v4899_v56 }
 0x452   :  { %v873_v62 = vadd.f32 %v869_v60, %v783_v57  ;;  %4020 = vmatprep.subr.mxu1 %v4899_v56  ;;  %4054 = vmatpush3.msra.mxu0 %v4999_v18 }
 0x453   :  { %v3933_v63 = vpop.f32.mrf.mxu0  ;;  %4021 = vmatpush3.msra.mxu1 %v5130_v15  ;;  %4055 = vmatprep.subr.mxu0 %v4899_v56 }
 0x454   :  { %4778 = vtanh.f32 %v873_v62  ;;  %4022 = vmatprep.subr.mxu1 %v4899_v56  ;;  %4056 = vmatpush3.msra.mxu0 %v5008_v22  ;;  %v5610_v62 = vld [vmem:[#allocation7 + $0x200] sm:$0xff] }
 0x455   :  { %4023 = vmatpush3.msra.mxu1 %v5136_v17  ;;  %4057 = vmatprep.subr.mxu0 %v4899_v56  ;;  %v5614_v63 = vld [vmem:[#allocation7 + $0x280] sm:$0xff] }
 0x456   :  { %4024 = vmatprep.subr.mxu1 %v4899_v56  ;;  %4058 = vmatpush3.msra.mxu0 %v5016_v27 }
 0x457   :  { %4025 = vmatpush3.msra.mxu1 %v5142_v19  ;;  %4059 = vmatprep.subr.mxu0 %v4899_v56 }
 0x458   :  { %4026 = vmatprep.subr.mxu1 %v4899_v56  ;;  %4060 = vmatpush3.msra.mxu0 %v5023_v31 }
 0x459   :  { %4027 = vmatpush3.msra.mxu1 %v5148_v21  ;;  %4061 = vmatprep.subr.mxu0 %v4899_v56 }
 0x45a   :  { %4028 = vmatprep.subr.mxu1 %v4899_v56  ;;  %4062 = vmatpush3.msra.mxu0 %v5031_v35 }
 0x45b   :  { %4029 = vmatpush3.msra.mxu1 %v5154_v23  ;;  %4063 = vmatprep.subr.mxu0 %v4899_v56 }
 0x45c   :  { %4030 = vmatprep.subr.mxu1 %v4899_v56  ;;  %4064 = vmatpush3.msra.mxu0 %v5038_v40 }
 0x45d   :  { %4031 = vmatpush3.msra.mxu1 %v5160_v25  ;;  %4065 = vmatprep.subr.mxu0 %v4899_v56 }
 0x45e   :  { %4032 = vmatprep.subr.mxu1 %v4899_v56  ;;  %4066 = vmatpush3.msra.mxu0 %v5049_v45 }
 0x45f   :  { %4033 = vmatpush3.msra.mxu1 %v5166_v26  ;;  %4067 = vmatprep.subr.mxu0 %v4899_v56 }
 0x460   :  { %4034 = vmatprep.subr.mxu1 %v4899_v56  ;;  %4068 = vmatpush3.msra.mxu0 %v5056_v48 }
 0x461   :  { %v5299_v0 = vpop.eup %4778  ;;  %4035 = vmatpush3.msra.mxu1 %v5172_v28  ;;  %4069 = vmatprep.subr.mxu0 %v4899_v56 }
 0x462   :  { %4037 = vmatmul.mubr.f32.vlgmr.msra.gmra.mxu1 %v5299_v0  ;;  %4074 = vmatprep.subr.mxu1 %v4899_v56 }
 0x463   :  { %4075 = vmatpush3.msra.mxu1 %v4971_v9  ;;  %4070 = vmatpush3.msra.mxu0 %v5065_v50 }
 0x464   :  { %4076 = vmatprep.subr.mxu1 %v4899_v56  ;;  %4071 = vmatprep.mubr.msk.f32.mxu0 %vm4900_vm0, %v4899_v56 }
 0x465   :  { %4077 = vmatpush3.msra.mxu1 %v4973_v10  ;;  %4106 = vmatprep.mubr.msk.f32.mxu1 %vm4900_vm0, %v4899_v56 }
 0x466   :  { %4078 = vmatprep.subr.mxu1 %v4899_v56  ;;  %4109 = vmatprep.subr.mxu0 %v4899_v56 }
 0x467   :  { %4079 = vmatpush3.msra.mxu1 %v4977_v11 }
 0x468   :  { %4080 = vmatprep.subr.mxu1 %v4899_v56 }
 0x469   :  { %4081 = vmatpush3.msra.mxu1 %v4981_v12 }
 0x46a   :  { %4082 = vmatprep.subr.mxu1 %v4899_v56 }
 0x46b   :  { %4083 = vmatpush3.msra.mxu1 %v4985_v13 }
 0x46c   :  { %4084 = vmatprep.subr.mxu1 %v4899_v56 }
 0x46d   :  { %4085 = vmatpush3.msra.mxu1 %v4989_v14 }
 0x46e   :  { %4086 = vmatprep.subr.mxu1 %v4899_v56 }
 0x46f   :  { %4087 = vmatpush3.msra.mxu1 %v4995_v16 }
 0x470   :  { %4088 = vmatprep.subr.mxu1 %v4899_v56 }
 0x471   :  { %4089 = vmatpush3.msra.mxu1 %v5003_v20 }
 0x472   :  { %4090 = vmatprep.subr.mxu1 %v4899_v56 }
 0x473   :  { %4091 = vmatpush3.msra.mxu1 %v5012_v24 }
 0x474   :  { %4092 = vmatprep.subr.mxu1 %v4899_v56 }
 0x475   :  { %4093 = vmatpush3.msra.mxu1 %v5021_v30 }
 0x476   :  { %4094 = vmatprep.subr.mxu1 %v4899_v56 }
 0x477   :  { %4095 = vmatpush3.msra.mxu1 %v5027_v33 }
 0x478   :  { %4096 = vmatprep.subr.mxu1 %v4899_v56 }
 0x479   :  { %4097 = vmatpush3.msra.mxu1 %v5036_v39 }
 0x47a   :  { %4098 = vmatprep.subr.mxu1 %v4899_v56 }
 0x47b   :  { %4099 = vmatpush3.msra.mxu1 %v5045_v43 }
 0x47c   :  { %4100 = vmatprep.subr.mxu1 %v4899_v56 }
 0x47d   :  { %4101 = vmatpush3.msra.mxu1 %v5054_v47 }
 0x47e   :  { %4102 = vmatprep.subr.mxu1 %v4899_v56 }
 0x47f   :  { %4103 = vmatpush3.msra.mxu1 %v5061_v49 }
 0x480   :  { %4104 = vmatprep.subr.mxu1 %v4899_v56 }
 0x481   :  { %4105 = vmatpush3.msra.mxu1 %v5068_v51 }
 0x482   :  { %4144 = vmatprep.subr.mxu1 %v4899_v56 }
 0x502   :  { %v960_v9 = vpop.f32.mrf.mxu1  ;;  %v1048_v10 = vpop.f32.mrf.mxu0 }
 0x503   :  { %v964_v11 = vadd.f32 %v960_v9, %v565_v1  ;;  %v1049_v58 = vadd.f32 %v5256_v54, %v1048_v10  ;;  %v575_v1 = vadd.f32 %v5083_v53, %v5227_v36  ;;  %v5639_v36 = vld [vmem:[#allocation7 + $0x360] sm:$0xff] }
 0x504   :  { %v3968_v12 = vpop.f32.mrf.mxu1  ;;  %v4003_v13 = vpop.f32.mrf.mxu0 }
 0x505   :  { %4780 = vtanh.f32 %v964_v11 }
 0x512   :  { %v4781_v14 = vpop.eup %4780 }
 0x513   :  { %4072 = vmatmul.mubr.f32.vlgmr.msra.gmra.mxu0 %v4781_v14  ;;  %4107 = vmatmul.mubr.f32.vlgmr.msra.gmra.mxu1 %v4781_v14  ;;  %v5625_v14 = vld [vmem:[#allocation7 + $0x378] sm:$0xff] }
 0x514   :  { %4110 = vmatpush3.msra.mxu0 %v5086_v59  ;;  %4141 = vmatprep.mubr.msk.f32.mxu0 %vm4900_vm0, %v4899_v56 }
 0x515   :  { %4111 = vmatprep.subr.mxu0 %v4899_v56  ;;  %4145 = vmatpush3.msra.mxu1 %v5345_v52 }
 0x516   :  { %4112 = vmatpush3.msra.mxu0 %v5088_v2  ;;  %4146 = vmatprep.subr.mxu1 %v4899_v56 }
 0x517   :  { %4113 = vmatprep.subr.mxu0 %v4899_v56  ;;  %4147 = vmatpush3.msra.mxu1 %v5350_v41 }
 0x518   :  { %4114 = vmatpush3.msra.mxu0 %v5094_v3  ;;  %4148 = vmatprep.subr.mxu1 %v4899_v56 }
 0x519   :  { %4115 = vmatprep.subr.mxu0 %v4899_v56  ;;  %4149 = vmatpush3.msra.mxu1 %v5356_v32 }
 0x51a   :  { %4116 = vmatpush3.msra.mxu0 %v5100_v4  ;;  %4150 = vmatprep.subr.mxu1 %v4899_v56 }
 0x51b   :  { %4117 = vmatprep.subr.mxu0 %v4899_v56  ;;  %4151 = vmatpush3.msra.mxu1 %v5362_v42 }
 0x51c   :  { %4118 = vmatpush3.msra.mxu0 %v5106_v5  ;;  %4152 = vmatprep.subr.mxu1 %v4899_v56 }
 0x51d   :  { %4119 = vmatprep.subr.mxu0 %v4899_v56  ;;  %4153 = vmatpush3.msra.mxu1 %v5368_v44 }
 0x51e   :  { %4120 = vmatpush3.msra.mxu0 %v5112_v6  ;;  %4154 = vmatprep.subr.mxu1 %v4899_v56 }
 0x51f   :  { %4121 = vmatprep.subr.mxu0 %v4899_v56  ;;  %4155 = vmatpush3.msra.mxu1 %v5374_v46 }
 0x520   :  { %4122 = vmatpush3.msra.mxu0 %v5118_v7  ;;  %4156 = vmatprep.subr.mxu1 %v4899_v56 }
 0x521   :  { %4123 = vmatprep.subr.mxu0 %v4899_v56  ;;  %4157 = vmatpush3.msra.mxu1 %v5380_v55 }
 0x522   :  { %v1134_v61 = vpop.f32.mrf.mxu1  ;;  %4124 = vmatpush3.msra.mxu0 %v5124_v8  ;;  %4158 = vmatprep.subr.mxu1 %v4899_v56 }
 0x523   :  { %v1138_v57 = vadd.f32 %v1134_v61, %v1049_v58  ;;  %4125 = vmatprep.subr.mxu0 %v4899_v56  ;;  %4159 = vmatpush3.msra.mxu1 %v4999_v18  ;;  %v5420_v18 = vld [vmem:[#allocation7 + $0x2f8] sm:$0xff]  ;;  %v5627_v61 = vld [vmem:[#allocation7 + $0x370] sm:$0xff] }
 0x524   :  { %v4038_v60 = vpop.f32.mrf.mxu1  ;;  %4126 = vmatpush3.msra.mxu0 %v5130_v15  ;;  %4160 = vmatprep.subr.mxu1 %v4899_v56 }
 0x525   :  { %4782 = vtanh.f32 %v1138_v57  ;;  %4127 = vmatprep.subr.mxu0 %v4899_v56  ;;  %4161 = vmatpush3.msra.mxu1 %v5008_v22  ;;  %v5645_v57 = vld [vmem:[#allocation7 + $0x358] sm:$0xff]  ;;  %v5651_v60 = vld [vmem:[#allocation7 + $0x350] sm:$0xff] }
 0x526   :  { %4128 = vmatpush3.msra.mxu0 %v5136_v17  ;;  %4162 = vmatprep.subr.mxu1 %v4899_v56 }
 0x527   :  { %4129 = vmatprep.subr.mxu0 %v4899_v56  ;;  %4163 = vmatpush3.msra.mxu1 %v5016_v27  ;;  %v5429_v27 = vld [vmem:[#allocation7 + $0x2f0] sm:$0xff] }
 0x528   :  { %4130 = vmatpush3.msra.mxu0 %v5142_v19  ;;  %4164 = vmatprep.subr.mxu1 %v4899_v56 }
 0x529   :  { %4131 = vmatprep.subr.mxu0 %v4899_v56  ;;  %4165 = vmatpush3.msra.mxu1 %v5023_v31  ;;  %v5434_v31 = vld [vmem:[#allocation7 + $0x2e8] sm:$0xff] }
 0x52a   :  { %4132 = vmatpush3.msra.mxu0 %v5148_v21  ;;  %4166 = vmatprep.subr.mxu1 %v4899_v56 }
 0x52b   :  { %4133 = vmatprep.subr.mxu0 %v4899_v56  ;;  %4167 = vmatpush3.msra.mxu1 %v5031_v35  ;;  %v5442_v35 = vld [vmem:[#allocation7 + $0x2e0] sm:$0xff] }
 0x52c   :  { %4134 = vmatpush3.msra.mxu0 %v5154_v23  ;;  %4168 = vmatprep.subr.mxu1 %v4899_v56 }
 0x52d   :  { %4135 = vmatprep.subr.mxu0 %v4899_v56  ;;  %4169 = vmatpush3.msra.mxu1 %v5038_v40  ;;  %v5447_v40 = vld [vmem:[#allocation7 + $0x2d8] sm:$0xff] }
 0x52e   :  { %4136 = vmatpush3.msra.mxu0 %v5160_v25  ;;  %4170 = vmatprep.subr.mxu1 %v4899_v56 }
 0x52f   :  { %4137 = vmatprep.subr.mxu0 %v4899_v56  ;;  %4171 = vmatpush3.msra.mxu1 %v5049_v45  ;;  %v5451_v45 = vld [vmem:[#allocation7 + $0x2d0] sm:$0xff] }
 0x530   :  { %4138 = vmatpush3.msra.mxu0 %v5166_v26  ;;  %4172 = vmatprep.subr.mxu1 %v4899_v56 }
 0x531   :  { %4139 = vmatprep.subr.mxu0 %v4899_v56  ;;  %4173 = vmatpush3.msra.mxu1 %v5056_v48 }
 0x532   :  { %v5423_v22 = vpop.eup %4782  ;;  %4140 = vmatpush3.msra.mxu0 %v5172_v28  ;;  %4174 = vmatprep.subr.mxu1 %v4899_v56 }
 0x533   :  { %4142 = vmatmul.mubr.f32.vlgmr.msra.gmra.mxu0 %v5423_v22  ;;  %4179 = vmatprep.subr.mxu0 %v4899_v56 }
 0x534   :  { %4180 = vmatpush3.msra.mxu0 %v5420_v18  ;;  %4175 = vmatpush3.msra.mxu1 %v5065_v50 }
 0x535   :  { %4181 = vmatprep.subr.mxu0 %v4899_v56  ;;  %4176 = vmatprep.mubr.msk.f32.mxu1 %vm4900_vm0, %v4899_v56 }
 0x536   :  { %4182 = vmatpush3.msra.mxu0 %v5429_v27  ;;  %4211 = vmatprep.mubr.msk.f32.mxu0 %vm4900_vm0, %v4899_v56 }
 0x537   :  { %4183 = vmatprep.subr.mxu0 %v4899_v56  ;;  %4214 = vmatprep.subr.mxu1 %v4899_v56 }
 0x538   :  { %4184 = vmatpush3.msra.mxu0 %v5434_v31 }
 0x539   :  { %4185 = vmatprep.subr.mxu0 %v4899_v56 }
 0x53a   :  { %4186 = vmatpush3.msra.mxu0 %v5442_v35 }
 0x53b   :  { %4187 = vmatprep.subr.mxu0 %v4899_v56 }
 0x53c   :  { %4188 = vmatpush3.msra.mxu0 %v5447_v40 }
 0x53d   :  { %4189 = vmatprep.subr.mxu0 %v4899_v56 }
 0x53e   :  { %4190 = vmatpush3.msra.mxu0 %v5451_v45 }
 0x53f   :  { %4191 = vmatprep.subr.mxu0 %v4899_v56 }
 0x540   :  { %4192 = vmatpush3.msra.mxu0 %v4995_v16  ;;  %v570_v16 = vadd.f32 %v5221_v29, %v5083_v53  ;;  %v5606_v29 = vld [vmem:[#allocation7 + $0x288] sm:$0xff] }
 0x541   :  { %4193 = vmatprep.subr.mxu0 %v4899_v56  ;;  %v5633_v53 = vld [vmem:[#allocation7 + $0x368] sm:$0xff] }
 0x542   :  { %4194 = vmatpush3.msra.mxu0 %v5003_v20 }
 0x543   :  { %4195 = vmatprep.subr.mxu0 %v4899_v56 }
 0x544   :  { %4196 = vmatpush3.msra.mxu0 %v5012_v24 }
 0x545   :  { %4197 = vmatprep.subr.mxu0 %v4899_v56 }
 0x546   :  { %4198 = vmatpush3.msra.mxu0 %v5021_v30 }
 0x547   :  { %4199 = vmatprep.subr.mxu0 %v4899_v56 }
 0x548   :  { %4200 = vmatpush3.msra.mxu0 %v5027_v33 }
 0x549   :  { %4201 = vmatprep.subr.mxu0 %v4899_v56 }
 0x54a   :  { %4202 = vmatpush3.msra.mxu0 %v5036_v39 }
 0x54b   :  { %4203 = vmatprep.subr.mxu0 %v4899_v56 }
 0x54c   :  { %4204 = vmatpush3.msra.mxu0 %v5045_v43 }
 0x54d   :  { %4205 = vmatprep.subr.mxu0 %v4899_v56 }
 0x54e   :  { %4206 = vmatpush3.msra.mxu0 %v5054_v47  ;;  %v5506_v47 = vld [vmem:[#allocation7 + $0x240] sm:$0xff] }
 0x54f   :  { %4207 = vmatprep.subr.mxu0 %v4899_v56 }
 0x550   :  { %4208 = vmatpush3.msra.mxu0 %v5061_v49 }
 0x551   :  { %4209 = vmatprep.subr.mxu0 %v4899_v56 }
 0x552   :  { %4210 = vmatpush3.msra.mxu0 %v5068_v51 }
 0x553   :  { %4249 = vmatprep.subr.mxu0 %v4899_v56 }
 0x5d3   :  { %v1226_v20 = vpop.f32.mrf.mxu0  ;;  %v1314_v24 = vpop.f32.mrf.mxu1 }
 0x5d4   :  { %v1230_v30 = vadd.f32 %v1226_v20, %v570_v16  ;;  %v1315_v48 = vadd.f32 %v5256_v54, %v1314_v24  ;;  %v5657_v16 = vld [vmem:[#allocation7 + $0x348] sm:$0xff]  ;;  %v5663_v20 = vld [vmem:[#allocation7 + $0x340] sm:$0xff] }
 0x5d5   :  { %v4073_v33 = vpop.f32.mrf.mxu0  ;;  %v4108_v39 = vpop.f32.mrf.mxu1 }
 0x5d6   :  { %4784 = vtanh.f32 %v1230_v30  ;;  %v5670_v30 = vld [vmem:[#allocation7 + $0x338] sm:$0xff] }
 0x5e3   :  { %v4785_v43 = vpop.eup %4784 }
 0x5e4   :  { %4177 = vmatmul.mubr.f32.vlgmr.msra.gmra.mxu1 %v4785_v43  ;;  %4212 = vmatmul.mubr.f32.vlgmr.msra.gmra.mxu0 %v4785_v43  ;;  %v5676_v43 = vld [vmem:[#allocation7 + $0x330] sm:$0xff] }
 0x5e5   :  { %4215 = vmatpush3.msra.mxu1 %v5086_v59  ;;  %4246 = vmatprep.mubr.msk.f32.mxu1 %vm4900_vm0, %v4899_v56 }
 0x5e6   :  { %4216 = vmatprep.subr.mxu1 %v4899_v56  ;;  %4250 = vmatpush3.msra.mxu0 %v5345_v52 }
 0x5e7   :  { %4217 = vmatpush3.msra.mxu1 %v5088_v2  ;;  %4251 = vmatprep.subr.mxu0 %v4899_v56  ;;  %v5549_v2 = vld [vmem:[#allocation7 + $0x2c8] sm:$0xff] }
 0x5e8   :  { %4218 = vmatprep.subr.mxu1 %v4899_v56  ;;  %4252 = vmatpush3.msra.mxu0 %v5350_v41 }
 0x5e9   :  { %4219 = vmatpush3.msra.mxu1 %v5094_v3  ;;  %4253 = vmatprep.subr.mxu0 %v4899_v56  ;;  %v5555_v3 = vld [vmem:[#allocation7 + $0x2c0] sm:$0xff] }
 0x5ea   :  { %4220 = vmatprep.subr.mxu1 %v4899_v56  ;;  %4254 = vmatpush3.msra.mxu0 %v5356_v32 }
 0x5eb   :  { %4221 = vmatpush3.msra.mxu1 %v5100_v4  ;;  %4255 = vmatprep.subr.mxu0 %v4899_v56  ;;  %v5558_v4 = vld [vmem:[#allocation7 + $0x238] sm:$0xff] }
 0x5ec   :  { %4222 = vmatprep.subr.mxu1 %v4899_v56  ;;  %4256 = vmatpush3.msra.mxu0 %v5362_v42 }
 0x5ed   :  { %4223 = vmatpush3.msra.mxu1 %v5106_v5  ;;  %4257 = vmatprep.subr.mxu0 %v4899_v56  ;;  %v5562_v5 = vld [vmem:[#allocation7 + $0x2b8] sm:$0xff] }
 0x5ee   :  { %4224 = vmatprep.subr.mxu1 %v4899_v56  ;;  %4258 = vmatpush3.msra.mxu0 %v5368_v44 }
 0x5ef   :  { %4225 = vmatpush3.msra.mxu1 %v5112_v6  ;;  %4259 = vmatprep.subr.mxu0 %v4899_v56  ;;  %v5566_v6 = vld [vmem:[#allocation7 + $0x230] sm:$0xff] }
 0x5f0   :  { %4226 = vmatprep.subr.mxu1 %v4899_v56  ;;  %4260 = vmatpush3.msra.mxu0 %v5374_v46 }
 0x5f1   :  { %4227 = vmatpush3.msra.mxu1 %v5118_v7  ;;  %4261 = vmatprep.subr.mxu0 %v4899_v56  ;;  %v5568_v7 = vld [vmem:[#allocation7 + $0x2b0] sm:$0xff] }
 0x5f2   :  { %4228 = vmatprep.subr.mxu1 %v4899_v56  ;;  %4262 = vmatpush3.msra.mxu0 %v5380_v55 }
 0x5f3   :  { %v1400_v49 = vpop.f32.mrf.mxu0  ;;  %4229 = vmatpush3.msra.mxu1 %v5124_v8  ;;  %4263 = vmatprep.subr.mxu0 %v4899_v56  ;;  %v5570_v8 = vld [vmem:[#allocation7 + $0x228] sm:$0xff] }
 0x5f4   :  { %v1404_v50 = vadd.f32 %v1400_v49, %v1315_v48  ;;  %4230 = vmatprep.subr.mxu1 %v4899_v56  ;;  %4264 = vmatpush3.msra.mxu0 %v5506_v47  ;;  %v5688_v49 = vld [vmem:[#allocation7 + $0x320] sm:$0xff] }
 0x5f5   :  { %v4143_v51 = vpop.f32.mrf.mxu0  ;;  %4231 = vmatpush3.msra.mxu1 %v5130_v15  ;;  %4265 = vmatprep.subr.mxu0 %v4899_v56  ;;  %v5574_v15 = vld [vmem:[#allocation7 + $0x2a8] sm:$0xff] }
 0x5f6   :  { %4786 = vtanh.f32 %v1404_v50  ;;  %4232 = vmatprep.subr.mxu1 %v4899_v56  ;;  %4281 = vmatprep.mubr.msk.f32.mxu0 %vm4900_vm0, %v4899_v56  ;;  %v5694_v50 = vld [vmem:[#allocation7 + $0x318] sm:$0xff]  ;;  %v5700_v51 = vld [vmem:[#allocation7 + $0x310] sm:$0xff] }
 0x5f7   :  { %4233 = vmatpush3.msra.mxu1 %v5136_v17  ;;  %4266 = vmatpush3.msra.mxu0 %v5558_v4  ;;  %v5578_v17 = vld [vmem:[#allocation7 + $0x220] sm:$0xff] }
 0x5f8   :  { %4234 = vmatprep.subr.mxu1 %v4899_v56  ;;  %4267 = vmatprep.subr.mxu0 %v4899_v56 }
 0x5f9   :  { %4235 = vmatpush3.msra.mxu1 %v5142_v19  ;;  %4268 = vmatpush3.msra.mxu0 %v5566_v6  ;;  %v5582_v19 = vld [vmem:[#allocation7 + $0x2a0] sm:$0xff] }
 0x5fa   :  { %4236 = vmatprep.subr.mxu1 %v4899_v56  ;;  %4269 = vmatprep.subr.mxu0 %v4899_v56 }
 0x5fb   :  { %4237 = vmatpush3.msra.mxu1 %v5148_v21  ;;  %4270 = vmatpush3.msra.mxu0 %v5570_v8  ;;  %v5586_v21 = vld [vmem:[#allocation7 + $0x218] sm:$0xff] }
 0x5fc   :  { %4238 = vmatprep.subr.mxu1 %v4899_v56  ;;  %4271 = vmatprep.subr.mxu0 %v4899_v56 }
 0x5fd   :  { %4239 = vmatpush3.msra.mxu1 %v5154_v23  ;;  %4272 = vmatpush3.msra.mxu0 %v5578_v17  ;;  %v5590_v23 = vld [vmem:[#allocation7 + $0x298] sm:$0xff] }
 0x5fe   :  { %4240 = vmatprep.subr.mxu1 %v4899_v56  ;;  %4273 = vmatprep.subr.mxu0 %v4899_v56 }
 0x5ff   :  { %4241 = vmatpush3.msra.mxu1 %v5160_v25  ;;  %v5594_v25 = vld [vmem:[#allocation7 + $0x210] sm:$0xff]  ;;  %4274 = vmatpush3.msra.mxu0 %v5586_v21 }
 0x600   :  { %4242 = vmatprep.subr.mxu1 %v4899_v56  ;;  %4275 = vmatprep.subr.mxu0 %v4899_v56 }
 0x601   :  { %4243 = vmatpush3.msra.mxu1 %v5166_v26  ;;  %v5598_v26 = vld [vmem:[#allocation7 + $0x290] sm:$0xff]  ;;  %4276 = vmatpush3.msra.mxu0 %v5594_v25 }
 0x602   :  { %4244 = vmatprep.subr.mxu1 %v4899_v56  ;;  %4277 = vmatprep.subr.mxu0 %v4899_v56 }
 0x603   :  { %v5532_v59 = vpop.eup %4786  ;;  %4245 = vmatpush3.msra.mxu1 %v5172_v28  ;;  %v5602_v28 = vld [vmem:[#allocation7 + $0x208] sm:$0xff] }
 0x604   :  { %4247 = vmatmul.mubr.f32.vlgmr.msra.gmra.mxu1 %v5532_v59  ;;  %4284 = vmatprep.subr.mxu1 %v4899_v56 }
 0x605   :  { %4285 = vmatpush3.msra.mxu1 %v5420_v18  ;;  %4316 = vmatprep.mubr.msk.f32.mxu1 %vm4900_vm0, %v4899_v56 }
 0x606   :  { %4286 = vmatprep.subr.mxu1 %v4899_v56  ;;  %4278 = vmatpush3.msra.mxu0 %v5602_v28 }
 0x607   :  { %4287 = vmatpush3.msra.mxu1 %v5429_v27  ;;  %4279 = vmatprep.subr.mxu0 %v4899_v56 }
 0x608   :  { %4288 = vmatprep.subr.mxu1 %v4899_v56  ;;  %4280 = vmatpush3.msra.mxu0 %v5610_v62 }
 0x609   :  { %4289 = vmatpush3.msra.mxu1 %v5434_v31  ;;  %4319 = vmatprep.subr.mxu0 %v4899_v56 }
 0x60a   :  { %4290 = vmatprep.subr.mxu1 %v4899_v56 }
 0x60b   :  { %4291 = vmatpush3.msra.mxu1 %v5442_v35 }
 0x60c   :  { %4292 = vmatprep.subr.mxu1 %v4899_v56 }
 0x60d   :  { %4293 = vmatpush3.msra.mxu1 %v5447_v40 }
 0x60e   :  { %4294 = vmatprep.subr.mxu1 %v4899_v56 }
 0x60f   :  { %4295 = vmatpush3.msra.mxu1 %v5451_v45 }
 0x610   :  { %4296 = vmatprep.subr.mxu1 %v4899_v56 }
 0x611   :  { %4297 = vmatpush3.msra.mxu1 %v5549_v2 }
 0x612   :  { %4298 = vmatprep.subr.mxu1 %v4899_v56 }
 0x613   :  { %4299 = vmatpush3.msra.mxu1 %v5555_v3 }
 0x614   :  { %4300 = vmatprep.subr.mxu1 %v4899_v56 }
 0x615   :  { %4301 = vmatpush3.msra.mxu1 %v5562_v5 }
 0x616   :  { %4302 = vmatprep.subr.mxu1 %v4899_v56 }
 0x617   :  { %4303 = vmatpush3.msra.mxu1 %v5568_v7 }
 0x618   :  { %4304 = vmatprep.subr.mxu1 %v4899_v56 }
 0x619   :  { %4305 = vmatpush3.msra.mxu1 %v5574_v15 }
 0x61a   :  { %4306 = vmatprep.subr.mxu1 %v4899_v56 }
 0x61b   :  { %4307 = vmatpush3.msra.mxu1 %v5582_v19 }
 0x61c   :  { %4308 = vmatprep.subr.mxu1 %v4899_v56 }
 0x61d   :  { %4309 = vmatpush3.msra.mxu1 %v5590_v23 }
 0x61e   :  { %4310 = vmatprep.subr.mxu1 %v4899_v56 }
 0x61f   :  { %4311 = vmatpush3.msra.mxu1 %v5598_v26 }
 0x620   :  { %4312 = vmatprep.subr.mxu1 %v4899_v56 }
 0x621   :  { %4313 = vmatpush3.msra.mxu1 %v5606_v29 }
 0x622   :  { %4314 = vmatprep.subr.mxu1 %v4899_v56 }
 0x623   :  { %4315 = vmatpush3.msra.mxu1 %v5614_v63 }
 0x624   :  { %4354 = vmatprep.subr.mxu1 %v4899_v56 }
 0x6a4   :  { %v1492_v9 = vpop.f32.mrf.mxu1  ;;  %v1580_v10 = vpop.f32.mrf.mxu0 }
 0x6a5   :  { %v1496_v11 = vadd.f32 %v1492_v9, %v575_v1  ;;  %v1581_v24 = vadd.f32 %v5256_v54, %v1580_v10  ;;  %v5682_v54 = vld [vmem:[#allocation7 + $0x328] sm:$0xff]  ;;  %v5712_v9 = vld [vmem:[#allocation7 + $0x300] sm:$0xff] }
 0x6a6   :  { %v4178_v12 = vpop.f32.mrf.mxu1  ;;  %v4213_v13 = vpop.f32.mrf.mxu0  ;;  %v5706_v1 = vld [vmem:[#allocation7 + $0x308] sm:$0xff] }
 0x6a7   :  { %4788 = vtanh.f32 %v1496_v11  ;;  %v5763_v11 = vld [vmem:[#allocation9 + $0x3] ss:$0 sm:$0xff] }
 0x6a8   :  { %v580_v12 = vadd.f32 %v5763_v11, %v5225_v34  ;;  %v5794_v34 = vld [vmem:[#allocation9 + $0x4] ss:$0 sm:$0xff] }
 0x6b4   :  { %v4789_v58 = vpop.eup %4788 }
 0x6b5   :  { %4282 = vmatmul.mubr.f32.vlgmr.msra.gmra.mxu0 %v4789_v58  ;;  %4317 = vmatmul.mubr.f32.vlgmr.msra.gmra.mxu1 %v4789_v58 }
 0x6b6   :  { %4320 = vmatpush3.msra.mxu0 %v5625_v14  ;;  %4351 = vmatprep.mubr.msk.f32.mxu0 %vm4900_vm0, %v4899_v56 }
 0x6b7   :  { %4321 = vmatprep.subr.mxu0 %v4899_v56  ;;  %4355 = vmatpush3.msra.mxu1 %v5345_v52 }
 0x6b8   :  { %4322 = vmatpush3.msra.mxu0 %v5627_v61  ;;  %4356 = vmatprep.subr.mxu1 %v4899_v56 }
 0x6b9   :  { %4323 = vmatprep.subr.mxu0 %v4899_v56  ;;  %4357 = vmatpush3.msra.mxu1 %v5350_v41 }
 0x6ba   :  { %4324 = vmatpush3.msra.mxu0 %v5633_v53  ;;  %4358 = vmatprep.subr.mxu1 %v4899_v56 }
 0x6bb   :  { %4325 = vmatprep.subr.mxu0 %v4899_v56  ;;  %4359 = vmatpush3.msra.mxu1 %v5356_v32 }
 0x6bc   :  { %4326 = vmatpush3.msra.mxu0 %v5639_v36  ;;  %4360 = vmatprep.subr.mxu1 %v4899_v56 }
 0x6bd   :  { %4327 = vmatprep.subr.mxu0 %v4899_v56  ;;  %4361 = vmatpush3.msra.mxu1 %v5362_v42 }
 0x6be   :  { %4328 = vmatpush3.msra.mxu0 %v5645_v57  ;;  %4362 = vmatprep.subr.mxu1 %v4899_v56 }
 0x6bf   :  { %4329 = vmatprep.subr.mxu0 %v4899_v56  ;;  %4363 = vmatpush3.msra.mxu1 %v5368_v44 }
 0x6c0   :  { %4330 = vmatpush3.msra.mxu0 %v5651_v60  ;;  %4364 = vmatprep.subr.mxu1 %v4899_v56 }
 0x6c1   :  { %4331 = vmatprep.subr.mxu0 %v4899_v56  ;;  %4365 = vmatpush3.msra.mxu1 %v5374_v46 }
 0x6c2   :  { %4332 = vmatpush3.msra.mxu0 %v5657_v16  ;;  %4366 = vmatprep.subr.mxu1 %v4899_v56 }
 0x6c3   :  { %4333 = vmatprep.subr.mxu0 %v4899_v56  ;;  %4367 = vmatpush3.msra.mxu1 %v5380_v55 }
 0x6c4   :  { %v1666_v33 = vpop.f32.mrf.mxu1  ;;  %4334 = vmatpush3.msra.mxu0 %v5663_v20  ;;  %4368 = vmatprep.subr.mxu1 %v4899_v56 }
 0x6c5   :  { %v1670_v39 = vadd.f32 %v1666_v33, %v1581_v24  ;;  %4335 = vmatprep.subr.mxu0 %v4899_v56  ;;  %4369 = vmatpush3.msra.mxu1 %v5506_v47 }
 0x6c6   :  { %v4248_v48 = vpop.f32.mrf.mxu1  ;;  %4336 = vmatpush3.msra.mxu0 %v5670_v30  ;;  %4370 = vmatprep.subr.mxu1 %v4899_v56 }
 0x6c7   :  { %4790 = vtanh.f32 %v1670_v39  ;;  %4337 = vmatprep.subr.mxu0 %v4899_v56  ;;  %4371 = vmatpush3.msra.mxu1 %v5558_v4 }
 0x6c8   :  { %4338 = vmatpush3.msra.mxu0 %v5676_v43  ;;  %4372 = vmatprep.subr.mxu1 %v4899_v56 }
 0x6c9   :  { %4339 = vmatprep.subr.mxu0 %v4899_v56  ;;  %4373 = vmatpush3.msra.mxu1 %v5566_v6 }
 0x6ca   :  { %4340 = vmatpush3.msra.mxu0 %v5682_v54  ;;  %4374 = vmatprep.subr.mxu1 %v4899_v56 }
 0x6cb   :  { %4341 = vmatprep.subr.mxu0 %v4899_v56  ;;  %4375 = vmatpush3.msra.mxu1 %v5570_v8 }
 0x6cc   :  { %4342 = vmatpush3.msra.mxu0 %v5688_v49  ;;  %4376 = vmatprep.subr.mxu1 %v4899_v56 }
 0x6cd   :  { %4343 = vmatprep.subr.mxu0 %v4899_v56  ;;  %4377 = vmatpush3.msra.mxu1 %v5578_v17 }
 0x6ce   :  { %4344 = vmatpush3.msra.mxu0 %v5694_v50  ;;  %4378 = vmatprep.subr.mxu1 %v4899_v56 }
 0x6cf   :  { %4345 = vmatprep.subr.mxu0 %v4899_v56  ;;  %4379 = vmatpush3.msra.mxu1 %v5586_v21 }
 0x6d0   :  { %4346 = vmatpush3.msra.mxu0 %v5700_v51  ;;  %4380 = vmatprep.subr.mxu1 %v4899_v56 }
 0x6d1   :  { %4347 = vmatprep.subr.mxu0 %v4899_v56  ;;  %4381 = vmatpush3.msra.mxu1 %v5594_v25 }
 0x6d2   :  { %4348 = vmatpush3.msra.mxu0 %v5706_v1  ;;  %4382 = vmatprep.subr.mxu1 %v4899_v56 }
 0x6d3   :  { %4349 = vmatprep.subr.mxu0 %v4899_v56  ;;  %4383 = vmatpush3.msra.mxu1 %v5602_v28 }
 0x6d4   :  { %v5719_v10 = vpop.eup %4790  ;;  %4350 = vmatpush3.msra.mxu0 %v5712_v9  ;;  %4384 = vmatprep.subr.mxu1 %v4899_v56 }
 0x6d5   :  { %4352 = vmatmul.mubr.f32.vlgmr.msra.gmra.mxu0 %v5719_v10  ;;  %4389 = vmatprep.subr.mxu0 %v4899_v56 }
 0x6d6   :  { %4390 = vmatpush3.msra.mxu0 %v5420_v18  ;;  %4385 = vmatpush3.msra.mxu1 %v5610_v62 }
 0x6d7   :  { %4391 = vmatprep.subr.mxu0 %v4899_v56  ;;  %4386 = vmatprep.mubr.msk.f32.mxu1 %vm4900_vm0, %v4899_v56 }
 0x6d8   :  { %4392 = vmatpush3.msra.mxu0 %v5429_v27  ;;  %4421 = vmatprep.mubr.msk.f32.mxu0 %vm4900_vm0, %v4899_v56 }
 0x6d9   :  { %4393 = vmatprep.subr.mxu0 %v4899_v56  ;;  %4424 = vmatprep.subr.mxu1 %v4899_v56 }
 0x6da   :  { %4394 = vmatpush3.msra.mxu0 %v5434_v31 }
 0x6db   :  { %4395 = vmatprep.subr.mxu0 %v4899_v56 }
 0x6dc   :  { %4396 = vmatpush3.msra.mxu0 %v5442_v35 }
 0x6dd   :  { %4397 = vmatprep.subr.mxu0 %v4899_v56 }
 0x6de   :  { %4398 = vmatpush3.msra.mxu0 %v5447_v40 }
 0x6df   :  { %4399 = vmatprep.subr.mxu0 %v4899_v56 }
 0x6e0   :  { %4400 = vmatpush3.msra.mxu0 %v5451_v45 }
 0x6e1   :  { %4401 = vmatprep.subr.mxu0 %v4899_v56 }
 0x6e2   :  { %4402 = vmatpush3.msra.mxu0 %v5549_v2 }
 0x6e3   :  { %4403 = vmatprep.subr.mxu0 %v4899_v56 }
 0x6e4   :  { %4404 = vmatpush3.msra.mxu0 %v5555_v3 }
 0x6e5   :  { %4405 = vmatprep.subr.mxu0 %v4899_v56 }
 0x6e6   :  { %4406 = vmatpush3.msra.mxu0 %v5562_v5 }
 0x6e7   :  { %4407 = vmatprep.subr.mxu0 %v4899_v56 }
 0x6e8   :  { %4408 = vmatpush3.msra.mxu0 %v5568_v7 }
 0x6e9   :  { %4409 = vmatprep.subr.mxu0 %v4899_v56 }
 0x6ea   :  { %4410 = vmatpush3.msra.mxu0 %v5574_v15 }
 0x6eb   :  { %4411 = vmatprep.subr.mxu0 %v4899_v56 }
 0x6ec   :  { %4412 = vmatpush3.msra.mxu0 %v5582_v19 }
 0x6ed   :  { %4413 = vmatprep.subr.mxu0 %v4899_v56 }
 0x6ee   :  { %4414 = vmatpush3.msra.mxu0 %v5590_v23 }
 0x6ef   :  { %4415 = vmatprep.subr.mxu0 %v4899_v56 }
 0x6f0   :  { %4416 = vmatpush3.msra.mxu0 %v5598_v26 }
 0x6f1   :  { %4417 = vmatprep.subr.mxu0 %v4899_v56 }
 0x6f2   :  { %4418 = vmatpush3.msra.mxu0 %v5606_v29 }
 0x6f3   :  { %4419 = vmatprep.subr.mxu0 %v4899_v56 }
 0x6f4   :  { %4420 = vmatpush3.msra.mxu0 %v5614_v63 }
 0x6f5   :  { %4459 = vmatprep.subr.mxu0 %v4899_v56 }
 0x775   :  { %v1758_v13 = vpop.f32.mrf.mxu0  ;;  %v1846_v58 = vpop.f32.mrf.mxu1 }
 0x776   :  { %v1762_v24 = vadd.f32 %v1758_v13, %v580_v12  ;;  %v2657_v12 = vmax.f32 %v5532_v59, 0.0  ;;  %v2658_v13 = vmax.f32 %v5719_v10, 0.0  ;;  %v2811_v59 = vld [vmem:[#allocation7 + $0x460] sm:$0xff]  ;;  %v2810_v10 = vld [vmem:[#allocation7 + $0x458] sm:$0xff] }
 0x777   :  { %v4283_v33 = vpop.f32.mrf.mxu0  ;;  %v4318_v39 = vpop.f32.mrf.mxu1 }
 0x778   :  { %4792 = vtanh.f32 %v1762_v24  ;;  %v2814_v39 = vld [vmem:[#allocation7 + $0x478] sm:$0xff] }
 0x785   :  { %v4793_v48 = vpop.eup %4792 }
 0x786   :  { %4387 = vmatmul.mubr.f32.vlgmr.msra.gmra.mxu1 %v4793_v48  ;;  %4422 = vmatmul.mubr.f32.vlgmr.msra.gmra.mxu0 %v4793_v48  ;;  %v2812_v48 = vld [vmem:[#allocation7 + $0x468] sm:$0xff] }
 0x787   :  { %4425 = vmatpush3.msra.mxu1 %v5625_v14  ;;  %4456 = vmatprep.mubr.msk.f32.mxu1 %vm4900_vm0, %v4899_v56 }
 0x788   :  { %4426 = vmatprep.subr.mxu1 %v4899_v56  ;;  %4460 = vmatpush3.msra.mxu0 %v5345_v52  ;;  %v1847_v52 = vadd.f32 %v5794_v34, %v1846_v58 }
 0x789   :  { %4427 = vmatpush3.msra.mxu1 %v5627_v61  ;;  %4461 = vmatprep.subr.mxu0 %v4899_v56 }
 0x78a   :  { %4428 = vmatprep.subr.mxu1 %v4899_v56  ;;  %4462 = vmatpush3.msra.mxu0 %v5350_v41 }
 0x78b   :  { %4429 = vmatpush3.msra.mxu1 %v5633_v53  ;;  %4463 = vmatprep.subr.mxu0 %v4899_v56 }
 0x78c   :  { %4430 = vmatprep.subr.mxu1 %v4899_v56  ;;  %4464 = vmatpush3.msra.mxu0 %v5356_v32 }
 0x78d   :  { %4431 = vmatpush3.msra.mxu1 %v5639_v36  ;;  %4465 = vmatprep.subr.mxu0 %v4899_v56 }
 0x78e   :  { %4432 = vmatprep.subr.mxu1 %v4899_v56  ;;  %4466 = vmatpush3.msra.mxu0 %v5362_v42 }
 0x78f   :  { %4433 = vmatpush3.msra.mxu1 %v5645_v57  ;;  %4467 = vmatprep.subr.mxu0 %v4899_v56 }
 0x790   :  { %4434 = vmatprep.subr.mxu1 %v4899_v56  ;;  %4468 = vmatpush3.msra.mxu0 %v5368_v44 }
 0x791   :  { %4435 = vmatpush3.msra.mxu1 %v5651_v60  ;;  %4469 = vmatprep.subr.mxu0 %v4899_v56 }
 0x792   :  { %4436 = vmatprep.subr.mxu1 %v4899_v56  ;;  %4470 = vmatpush3.msra.mxu0 %v5374_v46  ;;  %v585_v46 = vadd.f32 %v5763_v11, %v5231_v38  ;;  %v2485_v38 = vld [vmem:[#allocation7 + $0x2e8] sm:$0xff] }
 0x793   :  { %4437 = vmatpush3.msra.mxu1 %v5657_v16  ;;  %4471 = vmatprep.subr.mxu0 %v4899_v56 }
 0x794   :  { %4438 = vmatprep.subr.mxu1 %v4899_v56  ;;  %4472 = vmatpush3.msra.mxu0 %v5380_v55 }
 0x795   :  { %v1932_v41 = vpop.f32.mrf.mxu0  ;;  %4439 = vmatpush3.msra.mxu1 %v5663_v20  ;;  %4473 = vmatprep.subr.mxu0 %v4899_v56 }
 0x796   :  { %v1936_v32 = vadd.f32 %v1932_v41, %v1847_v52  ;;  %4440 = vmatprep.subr.mxu1 %v4899_v56  ;;  %4474 = vmatpush3.msra.mxu0 %v5506_v47  ;;  %v2486_v47 = vld [vmem:[#allocation7 + $0x2f0] sm:$0xff]  ;;  %v2808_v41 = vld [vmem:[#allocation7 + $0x448] sm:$0xff] }
 0x797   :  { %v4353_v42 = vpop.f32.mrf.mxu0  ;;  %4441 = vmatpush3.msra.mxu1 %v5670_v30  ;;  %4475 = vmatprep.subr.mxu0 %v4899_v56  ;;  %v2809_v52 = vld [vmem:[#allocation7 + $0x450] sm:$0xff] }
 0x798   :  { %4794 = vtanh.f32 %v1936_v32  ;;  %4442 = vmatprep.subr.mxu1 %v4899_v56  ;;  %4476 = vmatpush3.msra.mxu0 %v5558_v4  ;;  %v2484_v4 = vld [vmem:[#allocation7 + $0x2e0] sm:$0xff]  ;;  %v2806_v42 = vld [vmem:[#allocation7 + $0x438] sm:$0xff] }
 0x799   :  { %4443 = vmatpush3.msra.mxu1 %v5676_v43  ;;  %4477 = vmatprep.subr.mxu0 %v4899_v56  ;;  %v2807_v32 = vld [vmem:[#allocation7 + $0x440] sm:$0xff] }
 0x79a   :  { %4444 = vmatprep.subr.mxu1 %v4899_v56  ;;  %4478 = vmatpush3.msra.mxu0 %v5566_v6  ;;  %v2483_v6 = vld [vmem:[#allocation7 + $0x2d8] sm:$0xff] }
 0x79b   :  { %4445 = vmatpush3.msra.mxu1 %v5682_v54  ;;  %4479 = vmatprep.subr.mxu0 %v4899_v56 }
 0x79c   :  { %4446 = vmatprep.subr.mxu1 %v4899_v56  ;;  %4480 = vmatpush3.msra.mxu0 %v5570_v8  ;;  %v2482_v8 = vld [vmem:[#allocation7 + $0x2d0] sm:$0xff] }
 0x79d   :  { %4447 = vmatpush3.msra.mxu1 %v5688_v49  ;;  %4481 = vmatprep.subr.mxu0 %v4899_v56 }
 0x79e   :  { %4448 = vmatprep.subr.mxu1 %v4899_v56  ;;  %4482 = vmatpush3.msra.mxu0 %v5578_v17 }
 0x79f   :  { %4449 = vmatpush3.msra.mxu1 %v5694_v50  ;;  %4483 = vmatprep.subr.mxu0 %v4899_v56 }
 0x7a0   :  { %4450 = vmatprep.subr.mxu1 %v4899_v56  ;;  %4484 = vmatpush3.msra.mxu0 %v5586_v21 }
 0x7a1   :  { %4451 = vmatpush3.msra.mxu1 %v5700_v51  ;;  %4485 = vmatprep.subr.mxu0 %v4899_v56 }
 0x7a2   :  { %4452 = vmatprep.subr.mxu1 %v4899_v56  ;;  %4486 = vmatpush3.msra.mxu0 %v5594_v25 }
 0x7a3   :  { %4453 = vmatpush3.msra.mxu1 %v5706_v1  ;;  %4487 = vmatprep.subr.mxu0 %v4899_v56 }
 0x7a4   :  { %4454 = vmatprep.subr.mxu1 %v4899_v56  ;;  %4488 = vmatpush3.msra.mxu0 %v5602_v28 }
 0x7a5   :  { %v5831_v44 = vpop.eup %4794  ;;  %4455 = vmatpush3.msra.mxu1 %v5712_v9  ;;  %4489 = vmatprep.subr.mxu0 %v4899_v56 }
 0x7a6   :  { %4457 = vmatmul.mubr.f32.vlgmr.msra.gmra.mxu1 %v5831_v44  ;;  %4494 = vmatprep.subr.mxu1 %v4899_v56  ;;  %v2659_v58 = vmax.f32 %v5831_v44, 0.0  ;;  %v2805_v44 = vld [vmem:[#allocation7 + $0x430] sm:$0xff] }
 0x7a7   :  { %4495 = vmatpush3.msra.mxu1 %v5420_v18  ;;  %4490 = vmatpush3.msra.mxu0 %v5610_v62  ;;  %v2678_v62 = vld [vmem:[#allocation7 + $0x3f0] sm:$0xff] }
 0x7a8   :  { %4496 = vmatprep.subr.mxu1 %v4899_v56  ;;  %4491 = vmatprep.mubr.msk.f32.mxu0 %vm4900_vm0, %v4899_v56 }
 0x7a9   :  { %4497 = vmatpush3.msra.mxu1 %v5429_v27  ;;  %4526 = vmatprep.mubr.msk.f32.mxu1 %vm4900_vm0, %v4899_v56 }
 0x7aa   :  { %4498 = vmatprep.subr.mxu1 %v4899_v56  ;;  %4529 = vmatprep.subr.mxu0 %v4899_v56 }
 0x7ab   :  { %4499 = vmatpush3.msra.mxu1 %v5434_v31 }
 0x7ac   :  { %4500 = vmatprep.subr.mxu1 %v4899_v56 }
 0x7ad   :  { %4501 = vmatpush3.msra.mxu1 %v5442_v35 }
 0x7ae   :  { %4502 = vmatprep.subr.mxu1 %v4899_v56 }
 0x7af   :  { %4503 = vmatpush3.msra.mxu1 %v5447_v40 }
 0x7b0   :  { %4504 = vmatprep.subr.mxu1 %v4899_v56 }
 0x7b1   :  { %4505 = vmatpush3.msra.mxu1 %v5451_v45  ;;  %v2487_v45 = vld [vmem:[#allocation7 + $0x2f8] sm:$0xff] }
 0x7b2   :  { %4506 = vmatprep.subr.mxu1 %v4899_v56 }
 0x7b3   :  { %4507 = vmatpush3.msra.mxu1 %v5549_v2 }
 0x7b4   :  { %4508 = vmatprep.subr.mxu1 %v4899_v56 }
 0x7b5   :  { %4509 = vmatpush3.msra.mxu1 %v5555_v3 }
 0x7b6   :  { %4510 = vmatprep.subr.mxu1 %v4899_v56 }
 0x7b7   :  { %4511 = vmatpush3.msra.mxu1 %v5562_v5 }
 0x7b8   :  { %4512 = vmatprep.subr.mxu1 %v4899_v56 }
 0x7b9   :  { %4513 = vmatpush3.msra.mxu1 %v5568_v7 }
 0x7ba   :  { %4514 = vmatprep.subr.mxu1 %v4899_v56 }
 0x7bb   :  { %4515 = vmatpush3.msra.mxu1 %v5574_v15 }
 0x7bc   :  { %4516 = vmatprep.subr.mxu1 %v4899_v56 }
 0x7bd   :  { %4517 = vmatpush3.msra.mxu1 %v5582_v19 }
 0x7be   :  { %4518 = vmatprep.subr.mxu1 %v4899_v56 }
 0x7bf   :  { %4519 = vmatpush3.msra.mxu1 %v5590_v23 }
 0x7c0   :  { %4520 = vmatprep.subr.mxu1 %v4899_v56 }
 0x7c1   :  { %4521 = vmatpush3.msra.mxu1 %v5598_v26 }
 0x7c2   :  { %4522 = vmatprep.subr.mxu1 %v4899_v56 }
 0x7c3   :  { %4523 = vmatpush3.msra.mxu1 %v5606_v29 }
 0x7c4   :  { %4524 = vmatprep.subr.mxu1 %v4899_v56 }
 0x7c5   :  { %4525 = vmatpush3.msra.mxu1 %v5614_v63 }
 0x7c6   :  { %4564 = vmatprep.subr.mxu1 %v4899_v56 }
 0x846   :  { %v2024_v55 = vpop.f32.mrf.mxu1  ;;  %v2112_v18 = vpop.f32.mrf.mxu0 }
 0x847   :  { %v2028_v27 = vadd.f32 %v2024_v55, %v585_v46  ;;  %v2113_v17 = vadd.f32 %v5794_v34, %v2112_v18  ;;  %v2804_v46 = vld [vmem:[#allocation7 + $0x428] sm:$0xff]  ;;  %v2803_v55 = vld [vmem:[#allocation7 + $0x420] sm:$0xff]  ;;  %v2802_v18 = vld [vmem:[#allocation7 + $0x418] sm:$0xff] }
 0x848   :  { %v4388_v31 = vpop.f32.mrf.mxu1  ;;  %v4423_v35 = vpop.f32.mrf.mxu0 }
 0x849   :  { %4796 = vtanh.f32 %v2028_v27  ;;  %v2801_v27 = vld [vmem:[#allocation7 + $0x410] sm:$0xff]  ;;  %v2800_v31 = vld [vmem:[#allocation7 + $0x408] sm:$0xff]  ;;  %v2799_v35 = vld [vmem:[#allocation7 + $0x400] sm:$0xff] }
 0x856   :  { %v4797_v40 = vpop.eup %4796 }
 0x857   :  { %4492 = vmatmul.mubr.f32.vlgmr.msra.gmra.mxu0 %v4797_v40  ;;  %4527 = vmatmul.mubr.f32.vlgmr.msra.gmra.mxu1 %v4797_v40  ;;  %v2949_v40 = vld [vmem:[#allocation7 + $0x4f8] sm:$0xff] }
 0x858   :  { %4530 = vmatpush3.msra.mxu0 %v5625_v14  ;;  %4561 = vmatprep.mubr.msk.f32.mxu0 %vm4900_vm0, %v4899_v56 }
 0x859   :  { %4531 = vmatprep.subr.mxu0 %v4899_v56  ;;  %4565 = vmatpush3.msra.mxu1 %v2487_v45  ;;  %v2948_v45 = vld [vmem:[#allocation7 + $0x4f0] sm:$0xff] }
 0x85a   :  { %4532 = vmatpush3.msra.mxu0 %v5627_v61  ;;  %4566 = vmatprep.subr.mxu1 %v4899_v56 }
 0x85b   :  { %4533 = vmatprep.subr.mxu0 %v4899_v56  ;;  %4567 = vmatpush3.msra.mxu1 %v2486_v47  ;;  %v2947_v47 = vld [vmem:[#allocation7 + $0x4e8] sm:$0xff] }
 0x85c   :  { %4534 = vmatpush3.msra.mxu0 %v5633_v53  ;;  %4568 = vmatprep.subr.mxu1 %v4899_v56 }
 0x85d   :  { %4535 = vmatprep.subr.mxu0 %v4899_v56  ;;  %4569 = vmatpush3.msra.mxu1 %v2485_v38  ;;  %v2946_v38 = vld [vmem:[#allocation7 + $0x4e0] sm:$0xff] }
 0x85e   :  { %4536 = vmatpush3.msra.mxu0 %v5639_v36  ;;  %4570 = vmatprep.subr.mxu1 %v4899_v56 }
 0x85f   :  { %4537 = vmatprep.subr.mxu0 %v4899_v56  ;;  %4571 = vmatpush3.msra.mxu1 %v2484_v4  ;;  %v2945_v4 = vld [vmem:[#allocation7 + $0x4d8] sm:$0xff] }
 0x860   :  { %4538 = vmatpush3.msra.mxu0 %v5645_v57  ;;  %4572 = vmatprep.subr.mxu1 %v4899_v56 }
 0x861   :  { %4539 = vmatprep.subr.mxu0 %v4899_v56  ;;  %4573 = vmatpush3.msra.mxu1 %v2483_v6  ;;  %v2944_v6 = vld [vmem:[#allocation7 + $0x4d0] sm:$0xff] }
 0x862   :  { %4540 = vmatpush3.msra.mxu0 %v5651_v60  ;;  %4574 = vmatprep.subr.mxu1 %v4899_v56 }
 0x863   :  { %4541 = vmatprep.subr.mxu0 %v4899_v56  ;;  %4575 = vmatpush3.msra.mxu1 %v2482_v8  ;;  %v2943_v8 = vld [vmem:[#allocation7 + $0x4c8] sm:$0xff] }
 0x864   :  { %4542 = vmatpush3.msra.mxu0 %v5657_v16  ;;  %4576 = vmatprep.subr.mxu1 %v4899_v56 }
 0x865   :  { %4543 = vmatprep.subr.mxu0 %v4899_v56  ;;  %4577 = vmatpush3.msra.mxu1 %v5549_v2 }
 0x866   :  { %v2198_v21 = vpop.f32.mrf.mxu1  ;;  %4544 = vmatpush3.msra.mxu0 %v5663_v20  ;;  %4578 = vmatprep.subr.mxu1 %v4899_v56 }
 0x867   :  { %v2202_v25 = vadd.f32 %v2198_v21, %v2113_v17  ;;  %4545 = vmatprep.subr.mxu0 %v4899_v56  ;;  %4579 = vmatpush3.msra.mxu1 %v5555_v3  ;;  %v2679_v3 = vld [vmem:[#allocation7 + $0x3f8] sm:$0xff]  ;;  %v2942_v17 = vld [vmem:[#allocation7 + $0x4c0] sm:$0xff] }
 0x868   :  { %v4458_v28 = vpop.f32.mrf.mxu1  ;;  %4546 = vmatpush3.msra.mxu0 %v5670_v30  ;;  %4580 = vmatprep.subr.mxu1 %v4899_v56  ;;  %v2941_v21 = vld [vmem:[#allocation7 + $0x4b8] sm:$0xff] }
 0x869   :  { %4798 = vtanh.f32 %v2202_v25  ;;  %4547 = vmatprep.subr.mxu0 %v4899_v56  ;;  %4581 = vmatpush3.msra.mxu1 %v5562_v5  ;;  %v590_v5 = vadd.f32 %v5763_v11, %v5229_v37  ;;  %v2675_v37 = vld [vmem:[#allocation7 + $0x3d8] sm:$0xff]  ;;  %v2940_v25 = vld [vmem:[#allocation7 + $0x4b0] sm:$0xff]  ;;  %v2939_v28 = vld [vmem:[#allocation7 + $0x4a8] sm:$0xff] }
 0x86a   :  { %4548 = vmatpush3.msra.mxu0 %v5676_v43  ;;  %4582 = vmatprep.subr.mxu1 %v4899_v56 }
 0x86b   :  { %4549 = vmatprep.subr.mxu0 %v4899_v56  ;;  %4583 = vmatpush3.msra.mxu1 %v5568_v7 }
 0x86c   :  { %4550 = vmatpush3.msra.mxu0 %v5682_v54  ;;  %4584 = vmatprep.subr.mxu1 %v4899_v56 }
 0x86d   :  { %4551 = vmatprep.subr.mxu0 %v4899_v56  ;;  %4585 = vmatpush3.msra.mxu1 %v5574_v15 }
 0x86e   :  { %4552 = vmatpush3.msra.mxu0 %v5688_v49  ;;  %4586 = vmatprep.subr.mxu1 %v4899_v56 }
 0x86f   :  { %4553 = vmatprep.subr.mxu0 %v4899_v56  ;;  %4587 = vmatpush3.msra.mxu1 %v5582_v19 }
 0x870   :  { %4554 = vmatpush3.msra.mxu0 %v5694_v50  ;;  %4588 = vmatprep.subr.mxu1 %v4899_v56 }
 0x871   :  { %4555 = vmatprep.subr.mxu0 %v4899_v56  ;;  %4589 = vmatpush3.msra.mxu1 %v5590_v23 }
 0x872   :  { %4556 = vmatpush3.msra.mxu0 %v5700_v51  ;;  %4590 = vmatprep.subr.mxu1 %v4899_v56 }
 0x873   :  { %4557 = vmatprep.subr.mxu0 %v4899_v56  ;;  %4591 = vmatpush3.msra.mxu1 %v5598_v26 }
 0x874   :  { %4558 = vmatpush3.msra.mxu0 %v5706_v1  ;;  %4592 = vmatprep.subr.mxu1 %v4899_v56 }
 0x875   :  { %4559 = vmatprep.subr.mxu0 %v4899_v56  ;;  %4593 = vmatpush3.msra.mxu1 %v5606_v29 }
 0x876   :  { %v5933_v2 = vpop.eup %4798  ;;  %4560 = vmatpush3.msra.mxu0 %v5712_v9  ;;  %4594 = vmatprep.subr.mxu1 %v4899_v56 }
 0x877   :  { %4562 = vmatmul.mubr.f32.vlgmr.msra.gmra.mxu0 %v5933_v2  ;;  %4595 = vmatpush3.msra.mxu1 %v5614_v63  ;;  %v2655_v63 = vmax.f32 %v5299_v0, 0.0  ;;  %v2671_v0 = vld [vmem:[#allocation7 + $0x3b8] sm:$0xff]  ;;  %v2660_v24 = vmax.f32 %v5933_v2, 0.0  ;;  %v2938_v2 = vld [vmem:[#allocation7 + $0x4a0] sm:$0xff] }
 0x878   :  { %4596 = vmatprep.mubr.msk.f32.mxu1 %vm4900_vm0, %v4899_v56  ;;  %4599 = vmatprep.subr.mxu0 %v4899_v56 }
 0x879   :  { %4600 = vmatpush3.msra.mxu0 %v5625_v14  ;;  %4631 = vmatprep.mubr.msk.f32.mxu0 %vm4900_vm0, %v4899_v56  ;;  %v2676_v14 = vld [vmem:[#allocation7 + $0x3e0] sm:$0xff] }
 0x87a   :  { %4601 = vmatprep.subr.mxu0 %v4899_v56  ;;  %4634 = vmatprep.subr.mxu1 %v2679_v3 }
 0x87b   :  { %4602 = vmatpush3.msra.mxu0 %v5627_v61  ;;  %v2674_v61 = vld [vmem:[#allocation7 + $0x3d0] sm:$0xff] }
 0x87c   :  { %4603 = vmatprep.subr.mxu0 %v4899_v56 }
 0x87d   :  { %4604 = vmatpush3.msra.mxu0 %v5633_v53  ;;  %v2673_v53 = vld [vmem:[#allocation7 + $0x3c8] sm:$0xff] }
 0x87e   :  { %4605 = vmatprep.subr.mxu0 %v4899_v56 }
 0x87f   :  { %4606 = vmatpush3.msra.mxu0 %v5639_v36  ;;  %v2672_v36 = vld [vmem:[#allocation7 + $0x3c0] sm:$0xff] }
 0x880   :  { %4607 = vmatprep.subr.mxu0 %v4899_v56 }
 0x881   :  { %4608 = vmatpush3.msra.mxu0 %v5645_v57 }
 0x882   :  { %4609 = vmatprep.subr.mxu0 %v4899_v56 }
 0x883   :  { %4610 = vmatpush3.msra.mxu0 %v5651_v60 }
 0x884   :  { %4611 = vmatprep.subr.mxu0 %v4899_v56 }
 0x885   :  { %4612 = vmatpush3.msra.mxu0 %v5657_v16  ;;  %v2670_v16 = vld [vmem:[#allocation7 + $0x3b0] sm:$0xff] }
 0x886   :  { %4613 = vmatprep.subr.mxu0 %v4899_v56 }
 0x887   :  { %4614 = vmatpush3.msra.mxu0 %v5663_v20 }
 0x888   :  { %4615 = vmatprep.subr.mxu0 %v4899_v56 }
 0x889   :  { %4616 = vmatpush3.msra.mxu0 %v5670_v30 }
 0x88a   :  { %4617 = vmatprep.subr.mxu0 %v4899_v56 }
 0x88b   :  { %4618 = vmatpush3.msra.mxu0 %v5676_v43  ;;  %v2669_v43 = vld [vmem:[#allocation7 + $0x3a8] sm:$0xff] }
 0x88c   :  { %4619 = vmatprep.subr.mxu0 %v4899_v56 }
 0x88d   :  { %4620 = vmatpush3.msra.mxu0 %v5682_v54  ;;  %v2668_v54 = vld [vmem:[#allocation7 + $0x3a0] sm:$0xff] }
 0x88e   :  { %4621 = vmatprep.subr.mxu0 %v4899_v56 }
 0x88f   :  { %4622 = vmatpush3.msra.mxu0 %v5688_v49  ;;  %v2667_v49 = vld [vmem:[#allocation7 + $0x398] sm:$0xff] }
 0x890   :  { %4623 = vmatprep.subr.mxu0 %v4899_v56 }
 0x891   :  { %4624 = vmatpush3.msra.mxu0 %v5694_v50  ;;  %v2666_v50 = vld [vmem:[#allocation7 + $0x390] sm:$0xff] }
 0x892   :  { %4625 = vmatprep.subr.mxu0 %v4899_v56 }
 0x893   :  { %4626 = vmatpush3.msra.mxu0 %v5700_v51  ;;  %v2665_v51 = vld [vmem:[#allocation7 + $0x388] sm:$0xff] }
 0x894   :  { %4627 = vmatprep.subr.mxu0 %v4899_v56 }
 0x895   :  { %4628 = vmatpush3.msra.mxu0 %v5706_v1  ;;  %v2664_v1 = vld [vmem:[#allocation7 + $0x380] sm:$0xff] }
 0x896   :  { %4629 = vmatprep.subr.mxu0 %v4899_v56  ;;  %v2677_v56 = vld [vmem:[#allocation7 + $0x3e8] sm:$0xff] }
 0x897   :  { %4630 = vmatpush3.msra.mxu0 %v5712_v9  ;;  %v2656_v9 = vmax.f32 %v5423_v22, 0.0  ;;  %v2813_v22 = vld [vmem:[#allocation7 + $0x470] sm:$0xff] }
 0x898   :  { %4678 = vmatprep.subr.mxu0 %v2814_v39 }
 0x917   :  { %v2290_v7 = vpop.f32.mrf.mxu0  ;;  %v2378_v15 = vpop.f32.mrf.mxu1 }
 0x918   :  { %v2294_v19 = vadd.f32 %v2290_v7, %v590_v5  ;;  %v2379_v57 = vadd.f32 %v5794_v34, %v2378_v15  ;;  %v5985_v15 = vld [vmem:[#allocation9 + $0x5] ss:$0 sm:$0xff] }
 0x919   :  { %v4493_v23 = vpop.f32.mrf.mxu0  ;;  %v4528_v26 = vpop.f32.mrf.mxu1 }
 0x91a   :  { %4800 = vtanh.f32 %v2294_v19 }
 0x927   :  { %v4801_v29 = vpop.eup %4800 }
 0x928   :  { %4597 = vmatmul.mubr.f32.vlgmr.msra.gmra.mxu1 %v4801_v29 }
 0x929   :  { %4635 = vmatpush3.msra.mxu1 %v2679_v3  ;;  %4666 = vmatprep.mubr.f32.mxu1 %v2655_v63 }
 0x92a   :  { %4636 = vmatprep.subr.mxu1 %v2678_v62 }
 0x92b   :  { %4637 = vmatpush3.msra.mxu1 %v2678_v62 }
 0x92c   :  { %4638 = vmatprep.subr.mxu1 %v2677_v56 }
 0x92d   :  { %4639 = vmatpush3.msra.mxu1 %v2677_v56 }
 0x92e   :  { %4640 = vmatprep.subr.mxu1 %v2676_v14 }
 0x92f   :  { %4641 = vmatpush3.msra.mxu1 %v2676_v14 }
 0x930   :  { %4642 = vmatprep.subr.mxu1 %v2675_v37 }
 0x931   :  { %4643 = vmatpush3.msra.mxu1 %v2675_v37 }
 0x932   :  { %4644 = vmatprep.subr.mxu1 %v2674_v61 }
 0x933   :  { %4645 = vmatpush3.msra.mxu1 %v2674_v61 }
 0x934   :  { %4646 = vmatprep.subr.mxu1 %v2673_v53 }
 0x935   :  { %4647 = vmatpush3.msra.mxu1 %v2673_v53 }
 0x936   :  { %4648 = vmatprep.subr.mxu1 %v2672_v36 }
 0x937   :  { %v2464_v60 = vpop.f32.mrf.mxu0  ;;  %4649 = vmatpush3.msra.mxu1 %v2672_v36 }
 0x938   :  { %v2468_v20 = vadd.f32 %v2464_v60, %v2379_v57  ;;  %4650 = vmatprep.subr.mxu1 %v2671_v0 }
 0x939   :  { %v4563_v30 = vpop.f32.mrf.mxu0  ;;  %4651 = vmatpush3.msra.mxu1 %v2671_v0 }
 0x93a   :  { %4802 = vtanh.f32 %v2468_v20  ;;  %4652 = vmatprep.subr.mxu1 %v2670_v16 }
 0x93b   :  { %4653 = vmatpush3.msra.mxu1 %v2670_v16 }
 0x93c   :  { %4654 = vmatprep.subr.mxu1 %v2669_v43 }
 0x93d   :  { %4655 = vmatpush3.msra.mxu1 %v2669_v43 }
 0x93e   :  { %4656 = vmatprep.subr.mxu1 %v2668_v54 }
 0x93f   :  { %4657 = vmatpush3.msra.mxu1 %v2668_v54 }
 0x940   :  { %4658 = vmatprep.subr.mxu1 %v2667_v49 }
 0x941   :  { %4659 = vmatpush3.msra.mxu1 %v2667_v49 }
 0x942   :  { %4660 = vmatprep.subr.mxu1 %v2666_v50 }
 0x943   :  { %4661 = vmatpush3.msra.mxu1 %v2666_v50 }
 0x944   :  { %4662 = vmatprep.subr.mxu1 %v2665_v51 }
 0x945   :  { %4663 = vmatpush3.msra.mxu1 %v2665_v51  ;;  %v2937_v51 = vld [vmem:[#allocation7 + $0x498] sm:$0xff] }
 0x946   :  { %4664 = vmatprep.subr.mxu1 %v2664_v1 }
 0x947   :  { %v4803_v11 = vpop.eup %4802  ;;  %4665 = vmatpush3.msra.mxu1 %v2664_v1  ;;  %v2936_v1 = vld [vmem:[#allocation7 + $0x490] sm:$0xff] }
 0x948   :  { %4632 = vmatmul.mubr.f32.vlgmr.msra.gmra.mxu0 %v4803_v11  ;;  %4667 = vmatmul.mubr.f32.vlgmr.msra.gmra.mxu1 %v2656_v9  ;;  %v2661_v33 = vmax.f32 %v4803_v11, 0.0  ;;  %v2935_v9 = vld [vmem:[#allocation7 + $0x488] sm:$0xff]  ;;  %v2934_v11 = vld [vmem:[#allocation7 + $0x480] sm:$0xff] }
 0x949   :  { %4669 = vmatprep.mubr.f32.mxu1 %v2657_v12  ;;  %4679 = vmatpush3.msra.mxu0 %v2814_v39  ;;  %v3092_v12 = vld [vmem:[#allocation9 + $0x6] ss:$0 sm:$0xff] }
 0x94a   :  { %4680 = vmatprep.subr.mxu0 %v2813_v22  ;;  %4722 = vmatprep.subr.mxu1 %v2949_v40 }
 0x94b   :  { %4681 = vmatpush3.msra.mxu0 %v2813_v22  ;;  %4723 = vmatpush3.msra.mxu1 %v2949_v40 }
 0x94c   :  { %4670 = vmatmul.mubr.f32.gmra.mxu1 %v2658_v13  ;;  %4682 = vmatprep.subr.mxu0 %v2812_v48 }
 0x94d   :  { %4672 = vmatprep.mubr.f32.mxu1 %v2659_v58  ;;  %4683 = vmatpush3.msra.mxu0 %v2812_v48 }
 0x94e   :  { %4684 = vmatprep.subr.mxu0 %v2811_v59  ;;  %4724 = vmatprep.subr.mxu1 %v2948_v45 }
 0x94f   :  { %4685 = vmatpush3.msra.mxu0 %v2811_v59  ;;  %4725 = vmatpush3.msra.mxu1 %v2948_v45 }
 0x950   :  { %4673 = vmatmul.mubr.f32.gmra.mxu1 %v2660_v24  ;;  %4686 = vmatprep.subr.mxu0 %v2810_v10 }
 0x951   :  { %4675 = vmatprep.mubr.f32.mxu1 %v2661_v33  ;;  %4687 = vmatpush3.msra.mxu0 %v2810_v10 }
 0x952   :  { %4688 = vmatprep.subr.mxu0 %v2809_v52  ;;  %4726 = vmatprep.subr.mxu1 %v2947_v47 }
 0x953   :  { %4689 = vmatpush3.msra.mxu0 %v2809_v52  ;;  %4727 = vmatpush3.msra.mxu1 %v2947_v47 }
 0x954   :  { %4690 = vmatprep.subr.mxu0 %v2808_v41  ;;  %4728 = vmatprep.subr.mxu1 %v2946_v38 }
 0x955   :  { %4691 = vmatpush3.msra.mxu0 %v2808_v41  ;;  %4729 = vmatpush3.msra.mxu1 %v2946_v38 }
 0x956   :  { %4692 = vmatprep.subr.mxu0 %v2807_v32  ;;  %4730 = vmatprep.subr.mxu1 %v2945_v4 }
 0x957   :  { %4693 = vmatpush3.msra.mxu0 %v2807_v32  ;;  %4731 = vmatpush3.msra.mxu1 %v2945_v4  ;;  %v3093_v4 = vld [vmem:[#allocation9 + $0x7] ss:$0 sm:$0xff] }
 0x958   :  { %4694 = vmatprep.subr.mxu0 %v2806_v42  ;;  %4732 = vmatprep.subr.mxu1 %v2944_v6 }
 0x959   :  { %4695 = vmatpush3.msra.mxu0 %v2806_v42  ;;  %4733 = vmatpush3.msra.mxu1 %v2944_v6 }
 0x95a   :  { %4696 = vmatprep.subr.mxu0 %v2805_v44  ;;  %4734 = vmatprep.subr.mxu1 %v2943_v8 }
 0x95b   :  { %4697 = vmatpush3.msra.mxu0 %v2805_v44  ;;  %4735 = vmatpush3.msra.mxu1 %v2943_v8 }
 0x95c   :  { %4698 = vmatprep.subr.mxu0 %v2804_v46  ;;  %4736 = vmatprep.subr.mxu1 %v2942_v17 }
 0x95d   :  { %4699 = vmatpush3.msra.mxu0 %v2804_v46  ;;  %4737 = vmatpush3.msra.mxu1 %v2942_v17 }
 0x95e   :  { %4700 = vmatprep.subr.mxu0 %v2803_v55  ;;  %4738 = vmatprep.subr.mxu1 %v2941_v21 }
 0x95f   :  { %4701 = vmatpush3.msra.mxu0 %v2803_v55  ;;  %4739 = vmatpush3.msra.mxu1 %v2941_v21 }
 0x960   :  { %4702 = vmatprep.subr.mxu0 %v2802_v18  ;;  %4740 = vmatprep.subr.mxu1 %v2940_v25 }
 0x961   :  { %4703 = vmatpush3.msra.mxu0 %v2802_v18  ;;  %4741 = vmatpush3.msra.mxu1 %v2940_v25 }
 0x962   :  { %4704 = vmatprep.subr.mxu0 %v2801_v27  ;;  %4742 = vmatprep.subr.mxu1 %v2939_v28 }
 0x963   :  { %4705 = vmatpush3.msra.mxu0 %v2801_v27  ;;  %4743 = vmatpush3.msra.mxu1 %v2939_v28 }
 0x964   :  { %4706 = vmatprep.subr.mxu0 %v2800_v31  ;;  %4744 = vmatprep.subr.mxu1 %v2938_v2 }
 0x965   :  { %4707 = vmatpush3.msra.mxu0 %v2800_v31  ;;  %4745 = vmatpush3.msra.mxu1 %v2938_v2 }
 0x966   :  { %4708 = vmatprep.subr.mxu0 %v2799_v35  ;;  %4746 = vmatprep.subr.mxu1 %v2937_v51 }
 0x967   :  { %4709 = vmatpush3.msra.mxu0 %v2799_v35  ;;  %4747 = vmatpush3.msra.mxu1 %v2937_v51 }
 0x968   :  { %4748 = vmatprep.subr.mxu1 %v2936_v1 }
 0x969   :  { %4749 = vmatpush3.msra.mxu1 %v2936_v1 }
 0x96a   :  { %4750 = vmatprep.subr.mxu1 %v2935_v9 }
 0x96b   :  { %4751 = vmatpush3.msra.mxu1 %v2935_v9 }
 0x96c   :  { %4752 = vmatprep.subr.mxu1 %v2934_v11 }
 0x96d   :  { %4753 = vmatpush3.msra.mxu1 %v2934_v11 }
 0x9e8   :  { %v2554_v3 = vpop.f32.mrf.mxu1 }
 0x9e9   :  { %v2555_v7 = vadd.f32 %v5794_v34, %v2554_v3 }
 0x9ea   :  { %v4598_v5 = vpop.f32.mrf.mxu1 }
 0xa08   :  { %v2640_v19 = vpop.f32.mrf.mxu0  ;;  %v4668_v23 = vpop.f32.mrf.mxu1 }
 0xa09   :  { %v2644_v26 = vadd.f32 %v2640_v19, %v2555_v7  ;;  %v2757_v29 = vadd.f32 %v4668_v23, %v5985_v15 }
 0xa0a   :  { %v4633_v62 = vpop.f32.mrf.mxu0  ;;  %v2751_v63 = vpop.f32.mrf.mxu1 }
 0xa0b   :  { %4804 = vtanh.f32 %v2644_v26  ;;  %v2752_v56 = vadd.f32 %v5985_v15, %v2751_v63  ;;  %v2791_v61 = vmax.f32 %v2757_v29, 0.0 }
 0xa0c   :  { %v4671_v14 = vpop.f32.mrf.mxu1 }
 0xa0d   :  { %v2790_v37 = vmax.f32 %v2752_v56, 0.0  ;;  %v2767_v53 = vadd.f32 %v4671_v14, %v5985_v15 }
 0xa0e   :  { %v2761_v36 = vpop.f32.mrf.mxu1 }
 0xa0f   :  { %v2762_v34 = vadd.f32 %v5985_v15, %v2761_v36  ;;  %4710 = vmatprep.mubr.f32.mxu0 %v2790_v37  ;;  %v2793_v60 = vmax.f32 %v2767_v53, 0.0 }
 0xa10   :  { %v4674_v0 = vpop.f32.mrf.mxu1  ;;  %4711 = vmatmul.mubr.f32.vlgmr.msra.gmra.mxu0 %v2791_v61 }
 0xa11   :  { %v2792_v57 = vmax.f32 %v2762_v34, 0.0  ;;  %v2777_v16 = vadd.f32 %v4674_v0, %v5985_v15 }
 0xa12   :  { %v2771_v20 = vpop.f32.mrf.mxu1 }
 0xa13   :  { %v2772_v30 = vadd.f32 %v5985_v15, %v2771_v20  ;;  %4713 = vmatprep.mubr.f32.mxu0 %v2792_v57  ;;  %v2795_v54 = vmax.f32 %v2777_v16, 0.0 }
 0xa14   :  { %4714 = vmatmul.mubr.f32.gmra.mxu0 %v2793_v60 }
 0xa15   :  { %v2794_v43 = vmax.f32 %v2772_v30, 0.0 }
 0xa17   :  { %4716 = vmatprep.mubr.f32.mxu0 %v2794_v43 }
 0xa18   :  { %v4805_v49 = vpop.eup %4804  ;;  %4717 = vmatmul.mubr.f32.gmra.mxu0 %v2795_v54 }
 0xa19   :  { %v2662_v50 = vmax.f32 %v4805_v49, 0.0 }
 0xa1b   :  { %4676 = vmatmul.mubr.f32.gmra.mxu1 %v2662_v50 }
 0xad0   :  { %v4712_v13 = vpop.f32.mrf.mxu0 }
 0xad1   :  { %v2892_v58 = vadd.f32 %v4712_v13, %v3092_v12 }
 0xad2   :  { %v2886_v24 = vpop.f32.mrf.mxu0 }
 0xad3   :  { %v2887_v33 = vadd.f32 %v3092_v12, %v2886_v24  ;;  %v2926_v48 = vmax.f32 %v2892_v58, 0.0 }
 0xad4   :  { %v4715_v39 = vpop.f32.mrf.mxu0 }
 0xad5   :  { %v2925_v22 = vmax.f32 %v2887_v33, 0.0  ;;  %v2902_v59 = vadd.f32 %v4715_v39, %v3092_v12 }
 0xad6   :  { %v2896_v10 = vpop.f32.mrf.mxu0 }
 0xad7   :  { %v2897_v52 = vadd.f32 %v3092_v12, %v2896_v10  ;;  %4754 = vmatprep.mubr.f32.mxu1 %v2925_v22  ;;  %v2928_v42 = vmax.f32 %v2902_v59, 0.0 }
 0xad8   :  { %v4718_v41 = vpop.f32.mrf.mxu0  ;;  %4755 = vmatmul.mubr.f32.vlgmr.msra.gmra.mxu1 %v2926_v48 }
 0xad9   :  { %v2927_v32 = vmax.f32 %v2897_v52, 0.0  ;;  %v2912_v44 = vadd.f32 %v4718_v41, %v3092_v12 }
 0xada   :  { %v2906_v46 = vpop.f32.mrf.mxu0 }
 0xadb   :  { %v2907_v55 = vadd.f32 %v3092_v12, %v2906_v46  ;;  %v4677_v18 = vpop.f32.mrf.mxu1  ;;  %4757 = vmatprep.mubr.f32.mxu1 %v2927_v32  ;;  %v2930_v40 = vmax.f32 %v2912_v44, 0.0 }
 0xadc   :  { %4758 = vmatmul.mubr.f32.gmra.mxu1 %v2928_v42  ;;  %v2787_v31 = vadd.f32 %v4677_v18, %v5985_v15 }
 0xadd   :  { %v2929_v27 = vmax.f32 %v2907_v55, 0.0  ;;  %v2781_v35 = vpop.f32.mrf.mxu1 }
 0xade   :  { %v2782_v45 = vadd.f32 %v5985_v15, %v2781_v35  ;;  %v2797_v38 = vmax.f32 %v2787_v31, 0.0 }
 0xadf   :  { %4760 = vmatprep.mubr.f32.mxu1 %v2929_v27 }
 0xae0   :  { %v2796_v47 = vmax.f32 %v2782_v45, 0.0  ;;  %4761 = vmatmul.mubr.f32.gmra.mxu1 %v2930_v40 }
 0xae2   :  { %4719 = vmatprep.mubr.f32.mxu0 %v2796_v47 }
 0xae3   :  { %4720 = vmatmul.mubr.f32.gmra.mxu0 %v2797_v38 }
 0xb98   :  { %v4756_v6 = vpop.f32.mrf.mxu1 }
 0xb99   :  { %v3027_v8 = vadd.f32 %v4756_v6, %v3093_v4 }
 0xb9a   :  { %v3021_v17 = vpop.f32.mrf.mxu1 }
 0xb9b   :  { %3061 = vst [vmem:[#allocation10 + $0x8] sm:$0xff] %v3027_v8  ;;  %v3022_v21 = vadd.f32 %v3093_v4, %v3021_v17 }
 0xb9c   :  { %v4759_v25 = vpop.f32.mrf.mxu1 }
 0xb9d   :  { %3060 = vst [vmem:[#allocation10] sm:$0xff] %v3022_v21  ;;  %v3037_v28 = vadd.f32 %v4759_v25, %v3093_v4 }
 0xb9e   :  { %v3031_v2 = vpop.f32.mrf.mxu1 }
 0xb9f   :  { %3063 = vst [vmem:[#allocation10 + $0x18] sm:$0xff] %v3037_v28  ;;  %v3032_v3 = vadd.f32 %v3093_v4, %v3031_v2 }
 0xba0   :  { %v4762_v5 = vpop.f32.mrf.mxu1 }
 0xba1   :  { %3062 = vst [vmem:[#allocation10 + $0x10] sm:$0xff] %v3032_v3  ;;  %v3047_v7 = vadd.f32 %v4762_v5, %v3093_v4 }
 0xba2   :  { %v3041_v15 = vpop.f32.mrf.mxu1 }
 0xba3   :  { %3065 = vst [vmem:[#allocation10 + $0x28] sm:$0xff] %v3047_v7  ;;  %v3042_v19 = vadd.f32 %v3093_v4, %v3041_v15  ;;  %v4721_v23 = vpop.f32.mrf.mxu0 }
 0xba4   :  { %v2922_v26 = vadd.f32 %v4721_v23, %v3092_v12 }
 0xba5   :  { %3064 = vst [vmem:[#allocation10 + $0x20] sm:$0xff] %v3042_v19  ;;  %v2916_v29 = vpop.f32.mrf.mxu0 }
 0xba6   :  { %v2917_v62 = vadd.f32 %v3092_v12, %v2916_v29  ;;  %v2932_v56 = vmax.f32 %v2922_v26, 0.0 }
 0xba8   :  { %v2931_v63 = vmax.f32 %v2917_v62, 0.0 }
 0xbaa   :  { %4763 = vmatprep.mubr.f32.mxu1 %v2931_v63 }
 0xbab   :  { %4764 = vmatmul.mubr.f32.gmra.mxu1 %v2932_v56 }
 0xc6b   :  { %v4765_v14 = vpop.f32.mrf.mxu1 }
 0xc6c   :  { %v3057_v37 = vadd.f32 %v4765_v14, %v3093_v4 }
 0xc6d   :  { %v3051_v61 = vpop.f32.mrf.mxu1 }
 0xc6e   :  { %3067 = vst [vmem:[#allocation10 + $0x38] sm:$0xff] %v3057_v37  ;;  %v3052_v53 = vadd.f32 %v3093_v4, %v3051_v61 }
 0xc70   :  { %3066 = vst [vmem:[#allocation10 + $0x30] sm:$0xff] %v3052_v53 }
 0xc71   :  { %4879 = shalt.err (!%p4876_p5)
}
 0xc72   :  { %3079 = dma.vmem_to_hbm [thread:$0]  %s3074_s2, 1024, %s6004_s3, [#allocation6], %s4896_s17, %s4896_s17, %s4897_s18  }
 0xc73   :  { %4892 = dma.done.wait [#allocation6], 1024  }
 0xc74   :  { %4893 = vsyncadd [#allocation6], 4294966272 }
 0xc75   :  { %3083 = vsyncpa [#allocation5], 1 }
 0xc76   :  { %3084 = vsyncpa [#allocation8], 1 }
 0xc77   :  { %3085 = vsyncpa [#allocation6], 1 }

</bundles_post_ra>
